<compile_context>
chip_gen: v7x
topology: tpu7x:2x2x1
jax: 0.10.0
libtpu: 0.0.40
codegen_flags: <defaults>
</compile_context>

<pallas_src>
import functools

import jax
import jax.numpy as jnp
from jax.experimental import pallas as pl
from jax.experimental.pallas import tpu as pltpu


# ----------------------------------------------------------------------------
# Pallas kernel: whole sequence in one invocation
# ----------------------------------------------------------------------------
def _lstm_lm_kernel(x_ref,                        # (T*B, E)  time-major rows (t*B + b)
                    wih1_ref, whh1_ref, b1_ref,   # (E,4H), (H,4H), (1,4H)  cols [i,f,o|g]
                    wih2_ref, whh2_ref, b2_ref,   # (H,4H), (H,4H), (1,4H)  cols [i,f,o|g]
                    wout_ref, bout_ref,           # (H,Vp), (1,Vp)
                    out_ref,                      # (T*B, Vp) logits, time-major rows
                    h_out_ref, c_out_ref,         # (2, B, H) final states
                    xp_ref,                       # scratch (T*B, 4H): x @ W_ih1 + b1
                    h2_all_ref,                   # scratch (T*B, H): layer-2 h per step
                    *, B):
    TB = x_ref.shape[0]
    T = TB // B
    H = h_out_ref.shape[-1]

    # ---- Hoisted layer-1 input projection: one big MXU matmul, bias folded in.
    xp_ref[...] = (jnp.dot(x_ref[...], wih1_ref[...],
                           preferred_element_type=jnp.float32) + b1_ref[...])

    # Recurrent weights resident for the whole loop.
    whh1 = whh1_ref[...]
    wih2 = wih2_ref[...]
    whh2 = whh2_ref[...]
    b2 = jnp.broadcast_to(b2_ref[...], (B, 4 * H))    # broadcast hoisted out of loop

    def gates(pre, c):
        # Gate columns are pre-permuted to [i, f, o | g]:
        # one sigmoid pass over 3H cols + one tanh pass over H cols.
        sig = jax.nn.sigmoid(pre[:, :3 * H])
        g = jnp.tanh(pre[:, 3 * H:])
        i = sig[:, 0 * H:1 * H]
        f = sig[:, 1 * H:2 * H]
        o = sig[:, 2 * H:3 * H]
        c_new = f * c + i * g
        h_new = o * jnp.tanh(c_new)
        return h_new, c_new

    def step(t, carry):
        h1, c1, h2, c2 = carry
        row = t * B
        if B % 8 == 0:                 # static Python check: aligned-slice hint
            row = pl.multiple_of(row, 8)
        # Layer 1: only the recurrent matmul sits on the serial path.
        pre1 = xp_ref[pl.ds(row, B), :] + jnp.dot(
            h1, whh1, preferred_element_type=jnp.float32)
        h1, c1 = gates(pre1, c1)
        # Layer 2: two pushes (no lane-misaligned concat at H < 128).
        pre2 = (jnp.dot(h1, wih2, preferred_element_type=jnp.float32)
                + jnp.dot(h2, whh2, preferred_element_type=jnp.float32) + b2)
        h2, c2 = gates(pre2, c2)
        h2_all_ref[pl.ds(row, B), :] = h2   # stash for the batched projection
        return (h1, c1, h2, c2)

    z = jnp.zeros((B, H), jnp.float32)      # PyTorch default: zero initial states
    h1, c1, h2, c2 = jax.lax.fori_loop(0, T, step, (z, z, z, z),
                                       unroll=min(T, 8))

    h_out_ref[0] = h1
    h_out_ref[1] = h2
    c_out_ref[0] = c1
    c_out_ref[1] = c2

    # ---- Epilogue: one (T*B, H) @ (H, Vp) MXU push, one lane-dense bulk store.
    out_ref[...] = (jnp.dot(h2_all_ref[...], wout_ref[...],
                            preferred_element_type=jnp.float32) + bout_ref[...])


# ----------------------------------------------------------------------------
# Wrapper (glue: embedding gather, gate permutation, padding, pallas_call)
# ----------------------------------------------------------------------------
def _permute_gate_cols(w):
    """Reorder PyTorch gate columns [i, f, g, o] -> [i, f, o, g] (last axis)."""
    h4 = w.shape[-1]
    h = h4 // 4
    return jnp.concatenate(
        [w[..., :2 * h], w[..., 3 * h:], w[..., 2 * h:3 * h]], axis=-1)


def text_generation_forward(x_tokens, params):
    """x_tokens: int32 (B, T). Returns (logits (B,T,V), (h (2,B,H), c (2,B,H)))."""
    emb_table = params["embedding"]                        # (vocab, E)
    # Gather directly in time-major order (glue; XLA gather).
    x_emb = jnp.take(emb_table, x_tokens.T, axis=0)        # (T, B, E)
    T, B, E = x_emb.shape
    H = params["whh1"].shape[0]
    V = params["wout"].shape[1]
    Vp = ((V + 127) // 128) * 128                          # lane-dense logits

    x2d = x_emb.reshape(T * B, E)                          # row index = t*B + b

    wih1 = _permute_gate_cols(params["wih1"])
    whh1 = _permute_gate_cols(params["whh1"])
    b1 = _permute_gate_cols(params["b1"])
    wih2 = _permute_gate_cols(params["wih2"])
    whh2 = _permute_gate_cols(params["whh2"])
    b2 = _permute_gate_cols(params["b2"])

    wout = params["wout"]
    bout = params["bout"]
    if Vp != V:
        wout = jnp.pad(wout, ((0, 0), (0, Vp - V)))
        bout = jnp.pad(bout, ((0, 0), (0, Vp - V)))

    # Explicit scoped-VMEM budget (everything resident at these shapes).
    resident_elems = (
        T * B * E                                   # x
        + E * 4 * H + H * 4 * H + 4 * H             # layer-1 weights/bias
        + 2 * H * 4 * H + 4 * H                     # layer-2 weights/bias
        + H * Vp + Vp                               # output projection
        + T * B * Vp                                # logits out
        + 2 * 2 * B * H                             # h/c out
        + T * B * 4 * H + T * B * H                 # scratch (xp, h2_all)
    )
    vmem_limit = int(min(max(2 * 4 * resident_elems, 8 << 20), 64 << 20))

    def vmem_spec():
        return pl.BlockSpec(memory_space=pltpu.MemorySpace.VMEM)

    kernel = functools.partial(_lstm_lm_kernel, B=B)

    out2d, h_out, c_out = pl.pallas_call(
        kernel,
        out_shape=(
            jax.ShapeDtypeStruct((T * B, Vp), jnp.float32),
            jax.ShapeDtypeStruct((2, B, H), jnp.float32),
            jax.ShapeDtypeStruct((2, B, H), jnp.float32),
        ),
        in_specs=[vmem_spec() for _ in range(9)],
        out_specs=(vmem_spec(), vmem_spec(), vmem_spec()),
        scratch_shapes=[pltpu.VMEM((T * B, 4 * H), jnp.float32),
                        pltpu.VMEM((T * B, H), jnp.float32)],
        compiler_params=pltpu.CompilerParams(vmem_limit_bytes=vmem_limit),
    )(x2d, wih1, whh1, b1, wih2, whh2, b2, wout, bout)

    # reshape + transpose + pad-slice fuse into a single XLA copy.
    logits = out2d.reshape(T, B, Vp).swapaxes(0, 1)[:, :, :V]   # (B, T, V)
    return logits, (h_out, c_out)


# ----------------------------------------------------------------------------
# Pure-JAX reference (for correctness check)
# ----------------------------------------------------------------------------
def reference_forward(x_tokens, params):
    emb = jnp.take(params["embedding"], x_tokens, axis=0)  # (B, T, E)
    B, T, _ = emb.shape
    H = params["whh1"].shape[0]

    def cell(x, h, c, wih, whh, b):
        g = x @ wih + h @ whh + b
        i = jax.nn.sigmoid(g[:, :H])
        f = jax.nn.sigmoid(g[:, H:2 * H])
        gg = jnp.tanh(g[:, 2 * H:3 * H])
        o = jax.nn.sigmoid(g[:, 3 * H:])
        c = f * c + i * gg
        h = o * jnp.tanh(c)
        return h, c

    h1 = jnp.zeros((B, H), jnp.float32)
    c1 = jnp.zeros((B, H), jnp.float32)
    h2 = jnp.zeros((B, H), jnp.float32)
    c2 = jnp.zeros((B, H), jnp.float32)
    outs = []
    for t in range(T):
        h1, c1 = cell(emb[:, t], h1, c1, params["wih1"], params["whh1"], params["b1"])
        h2, c2 = cell(h1, h2, c2, params["wih2"], params["whh2"], params["b2"])
        outs.append(h2 @ params["wout"] + params["bout"])
    out = jnp.stack(outs, axis=1)
    return out, (jnp.stack([h1, h2]), jnp.stack([c1, c2]))


# ----------------------------------------------------------------------------
# Deterministic parameter init (shapes follow the PyTorch module's __init__)
# ----------------------------------------------------------------------------
def init_params(key, vocab, hidden):
    emb_size = hidden // 2
    ks = jax.random.split(key, 9)
    s = 0.1
    return {
        # nn.Embedding(vocab, hidden/2)
        "embedding": s * jax.random.normal(ks[0], (vocab, emb_size), jnp.float32),
        # LSTM layer 0: weight_ih_l0 (4H,E), weight_hh_l0 (4H,H) stored transposed,
        # biases b_ih + b_hh combined into one (1,4H) row. Gate col order i,f,g,o.
        "wih1": s * jax.random.normal(ks[1], (emb_size, 4 * hidden), jnp.float32),
        "whh1": s * jax.random.normal(ks[2], (hidden, 4 * hidden), jnp.float32),
        "b1": s * jax.random.normal(ks[3], (1, 4 * hidden), jnp.float32),
        # LSTM layer 1: weight_ih_l1 (4H,H), weight_hh_l1 (4H,H)
        "wih2": s * jax.random.normal(ks[4], (hidden, 4 * hidden), jnp.float32),
        "whh2": s * jax.random.normal(ks[5], (hidden, 4 * hidden), jnp.float32),
        "b2": s * jax.random.normal(ks[6], (1, 4 * hidden), jnp.float32),
        # nn.Linear(hidden, vocab)
        "wout": s * jax.random.normal(ks[7], (hidden, vocab), jnp.float32),
        "bout": s * jax.random.normal(ks[8], (1, vocab), jnp.float32),
    }


if __name__ == "__main__":
    BATCH = 2
    SEQ = 8
    VOCAB = 20
    HIDDEN = 32       # lstm_num_hidden (embedding_size = 16); num_layers = 2

    key = jax.random.PRNGKey(0)
    pkey, xkey = jax.random.split(key)
    params = init_params(pkey, VOCAB, HIDDEN)
    x_tokens = jax.random.randint(xkey, (BATCH, SEQ), 0, VOCAB, dtype=jnp.int32)

    logits, (h, c) = jax.jit(text_generation_forward)(x_tokens, params)
    jax.block_until_ready((logits, h, c))

    ref_logits, (ref_h, ref_c) = reference_forward(x_tokens, params)

    assert logits.shape == (BATCH, SEQ, VOCAB)
    assert h.shape == (2, BATCH, HIDDEN) and c.shape == (2, BATCH, HIDDEN)
    assert jnp.allclose(logits, ref_logits, rtol=1e-4, atol=1e-4)
    assert jnp.allclose(h, ref_h, rtol=1e-4, atol=1e-4)
    assert jnp.allclose(c, ref_c, rtol=1e-4, atol=1e-4)

    print("KERNEL_OK")
</pallas_src>

<mosaic_0001>
module attributes {stable_mosaic.version = 11 : i64} {
  func.func @_lstm_lm_kernel(%arg0: memref<16x16xf32, #tpu.memory_space<vmem>>, %arg1: memref<16x128xf32, #tpu.memory_space<vmem>>, %arg2: memref<32x128xf32, #tpu.memory_space<vmem>>, %arg3: memref<1x128xf32, #tpu.memory_space<vmem>>, %arg4: memref<32x128xf32, #tpu.memory_space<vmem>>, %arg5: memref<32x128xf32, #tpu.memory_space<vmem>>, %arg6: memref<1x128xf32, #tpu.memory_space<vmem>>, %arg7: memref<32x128xf32, #tpu.memory_space<vmem>>, %arg8: memref<1x128xf32, #tpu.memory_space<vmem>>, %arg9: memref<16x128xf32, #tpu.memory_space<vmem>>, %arg10: memref<2x2x32xf32, #tpu.memory_space<vmem>>, %arg11: memref<2x2x32xf32, #tpu.memory_space<vmem>>, %arg12: memref<16x128xf32, #tpu.memory_space<vmem>>, %arg13: memref<16x32xf32, #tpu.memory_space<vmem>>) attributes {dimension_semantics = [], scalar_prefetch = 0 : i64, scratch_operands = 2 : i64, tpu.core_type = #tpu.core_type<tc>} {
    %c0 = arith.constant 0 : index
    %c0_0 = arith.constant 0 : index
    %0 = vector.load %arg0[%c0, %c0_0] : memref<16x16xf32, #tpu.memory_space<vmem>>, vector<16x16xf32>
    %c0_1 = arith.constant 0 : index
    %c0_2 = arith.constant 0 : index
    %1 = vector.load %arg1[%c0_1, %c0_2] : memref<16x128xf32, #tpu.memory_space<vmem>>, vector<16x128xf32>
    %cst = arith.constant dense<0.000000e+00> : vector<16x128xf32>
    %2 = tpu.matmul %0, %1, %cst {dimension_numbers = #tpu.dot_dimension_numbers<[1], [0], [0], [1], [0, 0, 1, 1], [], []>} : vector<16x16xf32>, vector<16x128xf32>, vector<16x128xf32> -> vector<16x128xf32>
    %c0_3 = arith.constant 0 : index
    %c0_4 = arith.constant 0 : index
    %3 = vector.load %arg3[%c0_3, %c0_4] : memref<1x128xf32, #tpu.memory_space<vmem>>, vector<1x128xf32>
    %4 = vector.broadcast %3 : vector<1x128xf32> to vector<16x128xf32>
    %5 = arith.addf %2, %4 : vector<16x128xf32>
    %c0_5 = arith.constant 0 : index
    %c0_6 = arith.constant 0 : index
    %6 = vector.load %arg12[%c0_5, %c0_6] : memref<16x128xf32, #tpu.memory_space<vmem>>, vector<16x128xf32>
    tpu.vector_store %arg12[%c0_5, %c0_6], %5 {strides = array<i32>} : memref<16x128xf32, #tpu.memory_space<vmem>>, vector<16x128xf32>,
    %c0_7 = arith.constant 0 : index
    %c0_8 = arith.constant 0 : index
    %7 = vector.load %arg2[%c0_7, %c0_8] : memref<32x128xf32, #tpu.memory_space<vmem>>, vector<32x128xf32>
    %c0_9 = arith.constant 0 : index
    %c0_10 = arith.constant 0 : index
    %8 = vector.load %arg4[%c0_9, %c0_10] : memref<32x128xf32, #tpu.memory_space<vmem>>, vector<32x128xf32>
    %c0_11 = arith.constant 0 : index
    %c0_12 = arith.constant 0 : index
    %9 = vector.load %arg5[%c0_11, %c0_12] : memref<32x128xf32, #tpu.memory_space<vmem>>, vector<32x128xf32>
    %c0_13 = arith.constant 0 : index
    %c0_14 = arith.constant 0 : index
    %10 = vector.load %arg6[%c0_13, %c0_14] : memref<1x128xf32, #tpu.memory_space<vmem>>, vector<1x128xf32>
    %11 = vector.shape_cast %10 : vector<1x128xf32> to vector<1x128xf32>
    %12 = vector.broadcast %11 : vector<1x128xf32> to vector<2x128xf32>
    %cst_15 = arith.constant 0.000000e+00 : f32
    %13 = vector.broadcast %cst_15 : f32 to vector<2x32xf32>
    %c0_i32 = arith.constant 0 : i32
    %c2_i32 = arith.constant 2 : i32
    %14 = arith.muli %c0_i32, %c2_i32 : i32
    %15 = arith.index_cast %14 : i32 to index
    %c0_16 = arith.constant 0 : index
    %16 = vector.load %arg12[%15, %c0_16] : memref<16x128xf32, #tpu.memory_space<vmem>>, vector<2x128xf32>
    %cst_17 = arith.constant dense<0.000000e+00> : vector<2x128xf32>
    %17 = tpu.matmul %13, %7, %cst_17 {dimension_numbers = #tpu.dot_dimension_numbers<[1], [0], [0], [1], [0, 0, 1, 1], [], []>} : vector<2x32xf32>, vector<32x128xf32>, vector<2x128xf32> -> vector<2x128xf32>
    %18 = arith.addf %16, %17 : vector<2x128xf32>
    %19 = vector.extract_strided_slice %18 {offsets = [0, 0], sizes = [2, 96], strides = [1, 1]} : vector<2x128xf32> to vector<2x96xf32>
    %20 = arith.negf %19 : vector<2x96xf32>
    %21 = math.exp %20 : vector<2x96xf32>
    %cst_18 = arith.constant 1.000000e+00 : f32
    %22 = vector.broadcast %cst_18 : f32 to vector<2x96xf32>
    %23 = arith.addf %22, %21 : vector<2x96xf32>
    %24 = arith.divf %22, %23 : vector<2x96xf32>
    %25 = vector.extract_strided_slice %18 {offsets = [0, 96], sizes = [2, 32], strides = [1, 1]} : vector<2x128xf32> to vector<2x32xf32>
    %26 = math.tanh %25 : vector<2x32xf32>
    %27 = vector.extract_strided_slice %24 {offsets = [0, 0], sizes = [2, 32], strides = [1, 1]} : vector<2x96xf32> to vector<2x32xf32>
    %28 = vector.extract_strided_slice %24 {offsets = [0, 32], sizes = [2, 32], strides = [1, 1]} : vector<2x96xf32> to vector<2x32xf32>
    %29 = vector.extract_strided_slice %24 {offsets = [0, 64], sizes = [2, 32], strides = [1, 1]} : vector<2x96xf32> to vector<2x32xf32>
    %30 = arith.mulf %28, %13 : vector<2x32xf32>
    %31 = arith.mulf %27, %26 : vector<2x32xf32>
    %32 = arith.addf %30, %31 : vector<2x32xf32>
    %33 = math.tanh %32 : vector<2x32xf32>
    %34 = arith.mulf %29, %33 : vector<2x32xf32>
    %cst_19 = arith.constant dense<0.000000e+00> : vector<2x128xf32>
    %35 = tpu.matmul %34, %8, %cst_19 {dimension_numbers = #tpu.dot_dimension_numbers<[1], [0], [0], [1], [0, 0, 1, 1], [], []>} : vector<2x32xf32>, vector<32x128xf32>, vector<2x128xf32> -> vector<2x128xf32>
    %cst_20 = arith.constant dense<0.000000e+00> : vector<2x128xf32>
    %36 = tpu.matmul %13, %9, %cst_20 {dimension_numbers = #tpu.dot_dimension_numbers<[1], [0], [0], [1], [0, 0, 1, 1], [], []>} : vector<2x32xf32>, vector<32x128xf32>, vector<2x128xf32> -> vector<2x128xf32>
    %37 = arith.addf %35, %36 : vector<2x128xf32>
    %38 = arith.addf %37, %12 : vector<2x128xf32>
    %39 = vector.extract_strided_slice %38 {offsets = [0, 0], sizes = [2, 96], strides = [1, 1]} : vector<2x128xf32> to vector<2x96xf32>
    %40 = arith.negf %39 : vector<2x96xf32>
    %41 = math.exp %40 : vector<2x96xf32>
    %cst_21 = arith.constant 1.000000e+00 : f32
    %42 = vector.broadcast %cst_21 : f32 to vector<2x96xf32>
    %43 = arith.addf %42, %41 : vector<2x96xf32>
    %44 = arith.divf %42, %43 : vector<2x96xf32>
    %45 = vector.extract_strided_slice %38 {offsets = [0, 96], sizes = [2, 32], strides = [1, 1]} : vector<2x128xf32> to vector<2x32xf32>
    %46 = math.tanh %45 : vector<2x32xf32>
    %47 = vector.extract_strided_slice %44 {offsets = [0, 0], sizes = [2, 32], strides = [1, 1]} : vector<2x96xf32> to vector<2x32xf32>
    %48 = vector.extract_strided_slice %44 {offsets = [0, 32], sizes = [2, 32], strides = [1, 1]} : vector<2x96xf32> to vector<2x32xf32>
    %49 = vector.extract_strided_slice %44 {offsets = [0, 64], sizes = [2, 32], strides = [1, 1]} : vector<2x96xf32> to vector<2x32xf32>
    %50 = arith.mulf %48, %13 : vector<2x32xf32>
    %51 = arith.mulf %47, %46 : vector<2x32xf32>
    %52 = arith.addf %50, %51 : vector<2x32xf32>
    %53 = math.tanh %52 : vector<2x32xf32>
    %54 = arith.mulf %49, %53 : vector<2x32xf32>
    %55 = arith.index_cast %14 : i32 to index
    %c0_22 = arith.constant 0 : index
    %56 = vector.load %arg13[%55, %c0_22] : memref<16x32xf32, #tpu.memory_space<vmem>>, vector<2x32xf32>
    tpu.vector_store %arg13[%55, %c0_22], %54 {strides = array<i32>} : memref<16x32xf32, #tpu.memory_space<vmem>>, vector<2x32xf32>,
    %c1_i32 = arith.constant 1 : i32
    %c2_i32_23 = arith.constant 2 : i32
    %57 = arith.muli %c1_i32, %c2_i32_23 : i32
    %58 = arith.index_cast %57 : i32 to index
    %c0_24 = arith.constant 0 : index
    %59 = vector.load %arg12[%58, %c0_24] : memref<16x128xf32, #tpu.memory_space<vmem>>, vector<2x128xf32>
    %cst_25 = arith.constant dense<0.000000e+00> : vector<2x128xf32>
    %60 = tpu.matmul %34, %7, %cst_25 {dimension_numbers = #tpu.dot_dimension_numbers<[1], [0], [0], [1], [0, 0, 1, 1], [], []>} : vector<2x32xf32>, vector<32x128xf32>, vector<2x128xf32> -> vector<2x128xf32>
    %61 = arith.addf %59, %60 : vector<2x128xf32>
    %62 = vector.extract_strided_slice %61 {offsets = [0, 0], sizes = [2, 96], strides = [1, 1]} : vector<2x128xf32> to vector<2x96xf32>
    %63 = arith.negf %62 : vector<2x96xf32>
    %64 = math.exp %63 : vector<2x96xf32>
    %cst_26 = arith.constant 1.000000e+00 : f32
    %65 = vector.broadcast %cst_26 : f32 to vector<2x96xf32>
    %66 = arith.addf %65, %64 : vector<2x96xf32>
    %67 = arith.divf %65, %66 : vector<2x96xf32>
    %68 = vector.extract_strided_slice %61 {offsets = [0, 96], sizes = [2, 32], strides = [1, 1]} : vector<2x128xf32> to vector<2x32xf32>
    %69 = math.tanh %68 : vector<2x32xf32>
    %70 = vector.extract_strided_slice %67 {offsets = [0, 0], sizes = [2, 32], strides = [1, 1]} : vector<2x96xf32> to vector<2x32xf32>
    %71 = vector.extract_strided_slice %67 {offsets = [0, 32], sizes = [2, 32], strides = [1, 1]} : vector<2x96xf32> to vector<2x32xf32>
    %72 = vector.extract_strided_slice %67 {offsets = [0, 64], sizes = [2, 32], strides = [1, 1]} : vector<2x96xf32> to vector<2x32xf32>
    %73 = arith.mulf %71, %32 : vector<2x32xf32>
    %74 = arith.mulf %70, %69 : vector<2x32xf32>
    %75 = arith.addf %73, %74 : vector<2x32xf32>
    %76 = math.tanh %75 : vector<2x32xf32>
    %77 = arith.mulf %72, %76 : vector<2x32xf32>
    %cst_27 = arith.constant dense<0.000000e+00> : vector<2x128xf32>
    %78 = tpu.matmul %77, %8, %cst_27 {dimension_numbers = #tpu.dot_dimension_numbers<[1], [0], [0], [1], [0, 0, 1, 1], [], []>} : vector<2x32xf32>, vector<32x128xf32>, vector<2x128xf32> -> vector<2x128xf32>
    %cst_28 = arith.constant dense<0.000000e+00> : vector<2x128xf32>
    %79 = tpu.matmul %54, %9, %cst_28 {dimension_numbers = #tpu.dot_dimension_numbers<[1], [0], [0], [1], [0, 0, 1, 1], [], []>} : vector<2x32xf32>, vector<32x128xf32>, vector<2x128xf32> -> vector<2x128xf32>
    %80 = arith.addf %78, %79 : vector<2x128xf32>
    %81 = arith.addf %80, %12 : vector<2x128xf32>
    %82 = vector.extract_strided_slice %81 {offsets = [0, 0], sizes = [2, 96], strides = [1, 1]} : vector<2x128xf32> to vector<2x96xf32>
    %83 = arith.negf %82 : vector<2x96xf32>
    %84 = math.exp %83 : vector<2x96xf32>
    %cst_29 = arith.constant 1.000000e+00 : f32
    %85 = vector.broadcast %cst_29 : f32 to vector<2x96xf32>
    %86 = arith.addf %85, %84 : vector<2x96xf32>
    %87 = arith.divf %85, %86 : vector<2x96xf32>
    %88 = vector.extract_strided_slice %81 {offsets = [0, 96], sizes = [2, 32], strides = [1, 1]} : vector<2x128xf32> to vector<2x32xf32>
    %89 = math.tanh %88 : vector<2x32xf32>
    %90 = vector.extract_strided_slice %87 {offsets = [0, 0], sizes = [2, 32], strides = [1, 1]} : vector<2x96xf32> to vector<2x32xf32>
    %91 = vector.extract_strided_slice %87 {offsets = [0, 32], sizes = [2, 32], strides = [1, 1]} : vector<2x96xf32> to vector<2x32xf32>
    %92 = vector.extract_strided_slice %87 {offsets = [0, 64], sizes = [2, 32], strides = [1, 1]} : vector<2x96xf32> to vector<2x32xf32>
    %93 = arith.mulf %91, %52 : vector<2x32xf32>
    %94 = arith.mulf %90, %89 : vector<2x32xf32>
    %95 = arith.addf %93, %94 : vector<2x32xf32>
    %96 = math.tanh %95 : vector<2x32xf32>
    %97 = arith.mulf %92, %96 : vector<2x32xf32>
    %98 = arith.index_cast %57 : i32 to index
    %c0_30 = arith.constant 0 : index
    %99 = vector.load %arg13[%98, %c0_30] : memref<16x32xf32, #tpu.memory_space<vmem>>, vector<2x32xf32>
    tpu.vector_store %arg13[%98, %c0_30], %97 {strides = array<i32>} : memref<16x32xf32, #tpu.memory_space<vmem>>, vector<2x32xf32>,
    %c2_i32_31 = arith.constant 2 : i32
    %c2_i32_32 = arith.constant 2 : i32
    %100 = arith.muli %c2_i32_31, %c2_i32_32 : i32
    %101 = arith.index_cast %100 : i32 to index
    %c0_33 = arith.constant 0 : index
    %102 = vector.load %arg12[%101, %c0_33] : memref<16x128xf32, #tpu.memory_space<vmem>>, vector<2x128xf32>
    %cst_34 = arith.constant dense<0.000000e+00> : vector<2x128xf32>
    %103 = tpu.matmul %77, %7, %cst_34 {dimension_numbers = #tpu.dot_dimension_numbers<[1], [0], [0], [1], [0, 0, 1, 1], [], []>} : vector<2x32xf32>, vector<32x128xf32>, vector<2x128xf32> -> vector<2x128xf32>
    %104 = arith.addf %102, %103 : vector<2x128xf32>
    %105 = vector.extract_strided_slice %104 {offsets = [0, 0], sizes = [2, 96], strides = [1, 1]} : vector<2x128xf32> to vector<2x96xf32>
    %106 = arith.negf %105 : vector<2x96xf32>
    %107 = math.exp %106 : vector<2x96xf32>
    %cst_35 = arith.constant 1.000000e+00 : f32
    %108 = vector.broadcast %cst_35 : f32 to vector<2x96xf32>
    %109 = arith.addf %108, %107 : vector<2x96xf32>
    %110 = arith.divf %108, %109 : vector<2x96xf32>
    %111 = vector.extract_strided_slice %104 {offsets = [0, 96], sizes = [2, 32], strides = [1, 1]} : vector<2x128xf32> to vector<2x32xf32>
    %112 = math.tanh %111 : vector<2x32xf32>
    %113 = vector.extract_strided_slice %110 {offsets = [0, 0], sizes = [2, 32], strides = [1, 1]} : vector<2x96xf32> to vector<2x32xf32>
    %114 = vector.extract_strided_slice %110 {offsets = [0, 32], sizes = [2, 32], strides = [1, 1]} : vector<2x96xf32> to vector<2x32xf32>
    %115 = vector.extract_strided_slice %110 {offsets = [0, 64], sizes = [2, 32], strides = [1, 1]} : vector<2x96xf32> to vector<2x32xf32>
    %116 = arith.mulf %114, %75 : vector<2x32xf32>
    %117 = arith.mulf %113, %112 : vector<2x32xf32>
    %118 = arith.addf %116, %117 : vector<2x32xf32>
    %119 = math.tanh %118 : vector<2x32xf32>
    %120 = arith.mulf %115, %119 : vector<2x32xf32>
    %cst_36 = arith.constant dense<0.000000e+00> : vector<2x128xf32>
    %121 = tpu.matmul %120, %8, %cst_36 {dimension_numbers = #tpu.dot_dimension_numbers<[1], [0], [0], [1], [0, 0, 1, 1], [], []>} : vector<2x32xf32>, vector<32x128xf32>, vector<2x128xf32> -> vector<2x128xf32>
    %cst_37 = arith.constant dense<0.000000e+00> : vector<2x128xf32>
    %122 = tpu.matmul %97, %9, %cst_37 {dimension_numbers = #tpu.dot_dimension_numbers<[1], [0], [0], [1], [0, 0, 1, 1], [], []>} : vector<2x32xf32>, vector<32x128xf32>, vector<2x128xf32> -> vector<2x128xf32>
    %123 = arith.addf %121, %122 : vector<2x128xf32>
    %124 = arith.addf %123, %12 : vector<2x128xf32>
    %125 = vector.extract_strided_slice %124 {offsets = [0, 0], sizes = [2, 96], strides = [1, 1]} : vector<2x128xf32> to vector<2x96xf32>
    %126 = arith.negf %125 : vector<2x96xf32>
    %127 = math.exp %126 : vector<2x96xf32>
    %cst_38 = arith.constant 1.000000e+00 : f32
    %128 = vector.broadcast %cst_38 : f32 to vector<2x96xf32>
    %129 = arith.addf %128, %127 : vector<2x96xf32>
    %130 = arith.divf %128, %129 : vector<2x96xf32>
    %131 = vector.extract_strided_slice %124 {offsets = [0, 96], sizes = [2, 32], strides = [1, 1]} : vector<2x128xf32> to vector<2x32xf32>
    %132 = math.tanh %131 : vector<2x32xf32>
    %133 = vector.extract_strided_slice %130 {offsets = [0, 0], sizes = [2, 32], strides = [1, 1]} : vector<2x96xf32> to vector<2x32xf32>
    %134 = vector.extract_strided_slice %130 {offsets = [0, 32], sizes = [2, 32], strides = [1, 1]} : vector<2x96xf32> to vector<2x32xf32>
    %135 = vector.extract_strided_slice %130 {offsets = [0, 64], sizes = [2, 32], strides = [1, 1]} : vector<2x96xf32> to vector<2x32xf32>
    %136 = arith.mulf %134, %95 : vector<2x32xf32>
    %137 = arith.mulf %133, %132 : vector<2x32xf32>
    %138 = arith.addf %136, %137 : vector<2x32xf32>
    %139 = math.tanh %138 : vector<2x32xf32>
    %140 = arith.mulf %135, %139 : vector<2x32xf32>
    %141 = arith.index_cast %100 : i32 to index
    %c0_39 = arith.constant 0 : index
    %142 = vector.load %arg13[%141, %c0_39] : memref<16x32xf32, #tpu.memory_space<vmem>>, vector<2x32xf32>
    tpu.vector_store %arg13[%141, %c0_39], %140 {strides = array<i32>} : memref<16x32xf32, #tpu.memory_space<vmem>>, vector<2x32xf32>,
    %c3_i32 = arith.constant 3 : i32
    %c2_i32_40 = arith.constant 2 : i32
    %143 = arith.muli %c3_i32, %c2_i32_40 : i32
    %144 = arith.index_cast %143 : i32 to index
    %c0_41 = arith.constant 0 : index
    %145 = vector.load %arg12[%144, %c0_41] : memref<16x128xf32, #tpu.memory_space<vmem>>, vector<2x128xf32>
    %cst_42 = arith.constant dense<0.000000e+00> : vector<2x128xf32>
    %146 = tpu.matmul %120, %7, %cst_42 {dimension_numbers = #tpu.dot_dimension_numbers<[1], [0], [0], [1], [0, 0, 1, 1], [], []>} : vector<2x32xf32>, vector<32x128xf32>, vector<2x128xf32> -> vector<2x128xf32>
    %147 = arith.addf %145, %146 : vector<2x128xf32>
    %148 = vector.extract_strided_slice %147 {offsets = [0, 0], sizes = [2, 96], strides = [1, 1]} : vector<2x128xf32> to vector<2x96xf32>
    %149 = arith.negf %148 : vector<2x96xf32>
    %150 = math.exp %149 : vector<2x96xf32>
    %cst_43 = arith.constant 1.000000e+00 : f32
    %151 = vector.broadcast %cst_43 : f32 to vector<2x96xf32>
    %152 = arith.addf %151, %150 : vector<2x96xf32>
    %153 = arith.divf %151, %152 : vector<2x96xf32>
    %154 = vector.extract_strided_slice %147 {offsets = [0, 96], sizes = [2, 32], strides = [1, 1]} : vector<2x128xf32> to vector<2x32xf32>
    %155 = math.tanh %154 : vector<2x32xf32>
    %156 = vector.extract_strided_slice %153 {offsets = [0, 0], sizes = [2, 32], strides = [1, 1]} : vector<2x96xf32> to vector<2x32xf32>
    %157 = vector.extract_strided_slice %153 {offsets = [0, 32], sizes = [2, 32], strides = [1, 1]} : vector<2x96xf32> to vector<2x32xf32>
    %158 = vector.extract_strided_slice %153 {offsets = [0, 64], sizes = [2, 32], strides = [1, 1]} : vector<2x96xf32> to vector<2x32xf32>
    %159 = arith.mulf %157, %118 : vector<2x32xf32>
    %160 = arith.mulf %156, %155 : vector<2x32xf32>
    %161 = arith.addf %159, %160 : vector<2x32xf32>
    %162 = math.tanh %161 : vector<2x32xf32>
    %163 = arith.mulf %158, %162 : vector<2x32xf32>
    %cst_44 = arith.constant dense<0.000000e+00> : vector<2x128xf32>
    %164 = tpu.matmul %163, %8, %cst_44 {dimension_numbers = #tpu.dot_dimension_numbers<[1], [0], [0], [1], [0, 0, 1, 1], [], []>} : vector<2x32xf32>, vector<32x128xf32>, vector<2x128xf32> -> vector<2x128xf32>
    %cst_45 = arith.constant dense<0.000000e+00> : vector<2x128xf32>
    %165 = tpu.matmul %140, %9, %cst_45 {dimension_numbers = #tpu.dot_dimension_numbers<[1], [0], [0], [1], [0, 0, 1, 1], [], []>} : vector<2x32xf32>, vector<32x128xf32>, vector<2x128xf32> -> vector<2x128xf32>
    %166 = arith.addf %164, %165 : vector<2x128xf32>
    %167 = arith.addf %166, %12 : vector<2x128xf32>
    %168 = vector.extract_strided_slice %167 {offsets = [0, 0], sizes = [2, 96], strides = [1, 1]} : vector<2x128xf32> to vector<2x96xf32>
    %169 = arith.negf %168 : vector<2x96xf32>
    %170 = math.exp %169 : vector<2x96xf32>
    %cst_46 = arith.constant 1.000000e+00 : f32
    %171 = vector.broadcast %cst_46 : f32 to vector<2x96xf32>
    %172 = arith.addf %171, %170 : vector<2x96xf32>
    %173 = arith.divf %171, %172 : vector<2x96xf32>
    %174 = vector.extract_strided_slice %167 {offsets = [0, 96], sizes = [2, 32], strides = [1, 1]} : vector<2x128xf32> to vector<2x32xf32>
    %175 = math.tanh %174 : vector<2x32xf32>
    %176 = vector.extract_strided_slice %173 {offsets = [0, 0], sizes = [2, 32], strides = [1, 1]} : vector<2x96xf32> to vector<2x32xf32>
    %177 = vector.extract_strided_slice %173 {offsets = [0, 32], sizes = [2, 32], strides = [1, 1]} : vector<2x96xf32> to vector<2x32xf32>
    %178 = vector.extract_strided_slice %173 {offsets = [0, 64], sizes = [2, 32], strides = [1, 1]} : vector<2x96xf32> to vector<2x32xf32>
    %179 = arith.mulf %177, %138 : vector<2x32xf32>
    %180 = arith.mulf %176, %175 : vector<2x32xf32>
    %181 = arith.addf %179, %180 : vector<2x32xf32>
    %182 = math.tanh %181 : vector<2x32xf32>
    %183 = arith.mulf %178, %182 : vector<2x32xf32>
    %184 = arith.index_cast %143 : i32 to index
    %c0_47 = arith.constant 0 : index
    %185 = vector.load %arg13[%184, %c0_47] : memref<16x32xf32, #tpu.memory_space<vmem>>, vector<2x32xf32>
    tpu.vector_store %arg13[%184, %c0_47], %183 {strides = array<i32>} : memref<16x32xf32, #tpu.memory_space<vmem>>, vector<2x32xf32>,
    %c4_i32 = arith.constant 4 : i32
    %c2_i32_48 = arith.constant 2 : i32
    %186 = arith.muli %c4_i32, %c2_i32_48 : i32
    %187 = arith.index_cast %186 : i32 to index
    %c0_49 = arith.constant 0 : index
    %188 = vector.load %arg12[%187, %c0_49] : memref<16x128xf32, #tpu.memory_space<vmem>>, vector<2x128xf32>
    %cst_50 = arith.constant dense<0.000000e+00> : vector<2x128xf32>
    %189 = tpu.matmul %163, %7, %cst_50 {dimension_numbers = #tpu.dot_dimension_numbers<[1], [0], [0], [1], [0, 0, 1, 1], [], []>} : vector<2x32xf32>, vector<32x128xf32>, vector<2x128xf32> -> vector<2x128xf32>
    %190 = arith.addf %188, %189 : vector<2x128xf32>
    %191 = vector.extract_strided_slice %190 {offsets = [0, 0], sizes = [2, 96], strides = [1, 1]} : vector<2x128xf32> to vector<2x96xf32>
    %192 = arith.negf %191 : vector<2x96xf32>
    %193 = math.exp %192 : vector<2x96xf32>
    %cst_51 = arith.constant 1.000000e+00 : f32
    %194 = vector.broadcast %cst_51 : f32 to vector<2x96xf32>
    %195 = arith.addf %194, %193 : vector<2x96xf32>
    %196 = arith.divf %194, %195 : vector<2x96xf32>
    %197 = vector.extract_strided_slice %190 {offsets = [0, 96], sizes = [2, 32], strides = [1, 1]} : vector<2x128xf32> to vector<2x32xf32>
    %198 = math.tanh %197 : vector<2x32xf32>
    %199 = vector.extract_strided_slice %196 {offsets = [0, 0], sizes = [2, 32], strides = [1, 1]} : vector<2x96xf32> to vector<2x32xf32>
    %200 = vector.extract_strided_slice %196 {offsets = [0, 32], sizes = [2, 32], strides = [1, 1]} : vector<2x96xf32> to vector<2x32xf32>
    %201 = vector.extract_strided_slice %196 {offsets = [0, 64], sizes = [2, 32], strides = [1, 1]} : vector<2x96xf32> to vector<2x32xf32>
    %202 = arith.mulf %200, %161 : vector<2x32xf32>
    %203 = arith.mulf %199, %198 : vector<2x32xf32>
    %204 = arith.addf %202, %203 : vector<2x32xf32>
    %205 = math.tanh %204 : vector<2x32xf32>
    %206 = arith.mulf %201, %205 : vector<2x32xf32>
    %cst_52 = arith.constant dense<0.000000e+00> : vector<2x128xf32>
    %207 = tpu.matmul %206, %8, %cst_52 {dimension_numbers = #tpu.dot_dimension_numbers<[1], [0], [0], [1], [0, 0, 1, 1], [], []>} : vector<2x32xf32>, vector<32x128xf32>, vector<2x128xf32> -> vector<2x128xf32>
    %cst_53 = arith.constant dense<0.000000e+00> : vector<2x128xf32>
    %208 = tpu.matmul %183, %9, %cst_53 {dimension_numbers = #tpu.dot_dimension_numbers<[1], [0], [0], [1], [0, 0, 1, 1], [], []>} : vector<2x32xf32>, vector<32x128xf32>, vector<2x128xf32> -> vector<2x128xf32>
    %209 = arith.addf %207, %208 : vector<2x128xf32>
    %210 = arith.addf %209, %12 : vector<2x128xf32>
    %211 = vector.extract_strided_slice %210 {offsets = [0, 0], sizes = [2, 96], strides = [1, 1]} : vector<2x128xf32> to vector<2x96xf32>
    %212 = arith.negf %211 : vector<2x96xf32>
    %213 = math.exp %212 : vector<2x96xf32>
    %cst_54 = arith.constant 1.000000e+00 : f32
    %214 = vector.broadcast %cst_54 : f32 to vector<2x96xf32>
    %215 = arith.addf %214, %213 : vector<2x96xf32>
    %216 = arith.divf %214, %215 : vector<2x96xf32>
    %217 = vector.extract_strided_slice %210 {offsets = [0, 96], sizes = [2, 32], strides = [1, 1]} : vector<2x128xf32> to vector<2x32xf32>
    %218 = math.tanh %217 : vector<2x32xf32>
    %219 = vector.extract_strided_slice %216 {offsets = [0, 0], sizes = [2, 32], strides = [1, 1]} : vector<2x96xf32> to vector<2x32xf32>
    %220 = vector.extract_strided_slice %216 {offsets = [0, 32], sizes = [2, 32], strides = [1, 1]} : vector<2x96xf32> to vector<2x32xf32>
    %221 = vector.extract_strided_slice %216 {offsets = [0, 64], sizes = [2, 32], strides = [1, 1]} : vector<2x96xf32> to vector<2x32xf32>
    %222 = arith.mulf %220, %181 : vector<2x32xf32>
    %223 = arith.mulf %219, %218 : vector<2x32xf32>
    %224 = arith.addf %222, %223 : vector<2x32xf32>
    %225 = math.tanh %224 : vector<2x32xf32>
    %226 = arith.mulf %221, %225 : vector<2x32xf32>
    %227 = arith.index_cast %186 : i32 to index
    %c0_55 = arith.constant 0 : index
    %228 = vector.load %arg13[%227, %c0_55] : memref<16x32xf32, #tpu.memory_space<vmem>>, vector<2x32xf32>
    tpu.vector_store %arg13[%227, %c0_55], %226 {strides = array<i32>} : memref<16x32xf32, #tpu.memory_space<vmem>>, vector<2x32xf32>,
    %c5_i32 = arith.constant 5 : i32
    %c2_i32_56 = arith.constant 2 : i32
    %229 = arith.muli %c5_i32, %c2_i32_56 : i32
    %230 = arith.index_cast %229 : i32 to index
    %c0_57 = arith.constant 0 : index
    %231 = vector.load %arg12[%230, %c0_57] : memref<16x128xf32, #tpu.memory_space<vmem>>, vector<2x128xf32>
    %cst_58 = arith.constant dense<0.000000e+00> : vector<2x128xf32>
    %232 = tpu.matmul %206, %7, %cst_58 {dimension_numbers = #tpu.dot_dimension_numbers<[1], [0], [0], [1], [0, 0, 1, 1], [], []>} : vector<2x32xf32>, vector<32x128xf32>, vector<2x128xf32> -> vector<2x128xf32>
    %233 = arith.addf %231, %232 : vector<2x128xf32>
    %234 = vector.extract_strided_slice %233 {offsets = [0, 0], sizes = [2, 96], strides = [1, 1]} : vector<2x128xf32> to vector<2x96xf32>
    %235 = arith.negf %234 : vector<2x96xf32>
    %236 = math.exp %235 : vector<2x96xf32>
    %cst_59 = arith.constant 1.000000e+00 : f32
    %237 = vector.broadcast %cst_59 : f32 to vector<2x96xf32>
    %238 = arith.addf %237, %236 : vector<2x96xf32>
    %239 = arith.divf %237, %238 : vector<2x96xf32>
    %240 = vector.extract_strided_slice %233 {offsets = [0, 96], sizes = [2, 32], strides = [1, 1]} : vector<2x128xf32> to vector<2x32xf32>
    %241 = math.tanh %240 : vector<2x32xf32>
    %242 = vector.extract_strided_slice %239 {offsets = [0, 0], sizes = [2, 32], strides = [1, 1]} : vector<2x96xf32> to vector<2x32xf32>
    %243 = vector.extract_strided_slice %239 {offsets = [0, 32], sizes = [2, 32], strides = [1, 1]} : vector<2x96xf32> to vector<2x32xf32>
    %244 = vector.extract_strided_slice %239 {offsets = [0, 64], sizes = [2, 32], strides = [1, 1]} : vector<2x96xf32> to vector<2x32xf32>
    %245 = arith.mulf %243, %204 : vector<2x32xf32>
    %246 = arith.mulf %242, %241 : vector<2x32xf32>
    %247 = arith.addf %245, %246 : vector<2x32xf32>
    %248 = math.tanh %247 : vector<2x32xf32>
    %249 = arith.mulf %244, %248 : vector<2x32xf32>
    %cst_60 = arith.constant dense<0.000000e+00> : vector<2x128xf32>
    %250 = tpu.matmul %249, %8, %cst_60 {dimension_numbers = #tpu.dot_dimension_numbers<[1], [0], [0], [1], [0, 0, 1, 1], [], []>} : vector<2x32xf32>, vector<32x128xf32>, vector<2x128xf32> -> vector<2x128xf32>
    %cst_61 = arith.constant dense<0.000000e+00> : vector<2x128xf32>
    %251 = tpu.matmul %226, %9, %cst_61 {dimension_numbers = #tpu.dot_dimension_numbers<[1], [0], [0], [1], [0, 0, 1, 1], [], []>} : vector<2x32xf32>, vector<32x128xf32>, vector<2x128xf32> -> vector<2x128xf32>
    %252 = arith.addf %250, %251 : vector<2x128xf32>
    %253 = arith.addf %252, %12 : vector<2x128xf32>
    %254 = vector.extract_strided_slice %253 {offsets = [0, 0], sizes = [2, 96], strides = [1, 1]} : vector<2x128xf32> to vector<2x96xf32>
    %255 = arith.negf %254 : vector<2x96xf32>
    %256 = math.exp %255 : vector<2x96xf32>
    %cst_62 = arith.constant 1.000000e+00 : f32
    %257 = vector.broadcast %cst_62 : f32 to vector<2x96xf32>
    %258 = arith.addf %257, %256 : vector<2x96xf32>
    %259 = arith.divf %257, %258 : vector<2x96xf32>
    %260 = vector.extract_strided_slice %253 {offsets = [0, 96], sizes = [2, 32], strides = [1, 1]} : vector<2x128xf32> to vector<2x32xf32>
    %261 = math.tanh %260 : vector<2x32xf32>
    %262 = vector.extract_strided_slice %259 {offsets = [0, 0], sizes = [2, 32], strides = [1, 1]} : vector<2x96xf32> to vector<2x32xf32>
    %263 = vector.extract_strided_slice %259 {offsets = [0, 32], sizes = [2, 32], strides = [1, 1]} : vector<2x96xf32> to vector<2x32xf32>
    %264 = vector.extract_strided_slice %259 {offsets = [0, 64], sizes = [2, 32], strides = [1, 1]} : vector<2x96xf32> to vector<2x32xf32>
    %265 = arith.mulf %263, %224 : vector<2x32xf32>
    %266 = arith.mulf %262, %261 : vector<2x32xf32>
    %267 = arith.addf %265, %266 : vector<2x32xf32>
    %268 = math.tanh %267 : vector<2x32xf32>
    %269 = arith.mulf %264, %268 : vector<2x32xf32>
    %270 = arith.index_cast %229 : i32 to index
    %c0_63 = arith.constant 0 : index
    %271 = vector.load %arg13[%270, %c0_63] : memref<16x32xf32, #tpu.memory_space<vmem>>, vector<2x32xf32>
    tpu.vector_store %arg13[%270, %c0_63], %269 {strides = array<i32>} : memref<16x32xf32, #tpu.memory_space<vmem>>, vector<2x32xf32>,
    %c6_i32 = arith.constant 6 : i32
    %c2_i32_64 = arith.constant 2 : i32
    %272 = arith.muli %c6_i32, %c2_i32_64 : i32
    %273 = arith.index_cast %272 : i32 to index
    %c0_65 = arith.constant 0 : index
    %274 = vector.load %arg12[%273, %c0_65] : memref<16x128xf32, #tpu.memory_space<vmem>>, vector<2x128xf32>
    %cst_66 = arith.constant dense<0.000000e+00> : vector<2x128xf32>
    %275 = tpu.matmul %249, %7, %cst_66 {dimension_numbers = #tpu.dot_dimension_numbers<[1], [0], [0], [1], [0, 0, 1, 1], [], []>} : vector<2x32xf32>, vector<32x128xf32>, vector<2x128xf32> -> vector<2x128xf32>
    %276 = arith.addf %274, %275 : vector<2x128xf32>
    %277 = vector.extract_strided_slice %276 {offsets = [0, 0], sizes = [2, 96], strides = [1, 1]} : vector<2x128xf32> to vector<2x96xf32>
    %278 = arith.negf %277 : vector<2x96xf32>
    %279 = math.exp %278 : vector<2x96xf32>
    %cst_67 = arith.constant 1.000000e+00 : f32
    %280 = vector.broadcast %cst_67 : f32 to vector<2x96xf32>
    %281 = arith.addf %280, %279 : vector<2x96xf32>
    %282 = arith.divf %280, %281 : vector<2x96xf32>
    %283 = vector.extract_strided_slice %276 {offsets = [0, 96], sizes = [2, 32], strides = [1, 1]} : vector<2x128xf32> to vector<2x32xf32>
    %284 = math.tanh %283 : vector<2x32xf32>
    %285 = vector.extract_strided_slice %282 {offsets = [0, 0], sizes = [2, 32], strides = [1, 1]} : vector<2x96xf32> to vector<2x32xf32>
    %286 = vector.extract_strided_slice %282 {offsets = [0, 32], sizes = [2, 32], strides = [1, 1]} : vector<2x96xf32> to vector<2x32xf32>
    %287 = vector.extract_strided_slice %282 {offsets = [0, 64], sizes = [2, 32], strides = [1, 1]} : vector<2x96xf32> to vector<2x32xf32>
    %288 = arith.mulf %286, %247 : vector<2x32xf32>
    %289 = arith.mulf %285, %284 : vector<2x32xf32>
    %290 = arith.addf %288, %289 : vector<2x32xf32>
    %291 = math.tanh %290 : vector<2x32xf32>
    %292 = arith.mulf %287, %291 : vector<2x32xf32>
    %cst_68 = arith.constant dense<0.000000e+00> : vector<2x128xf32>
    %293 = tpu.matmul %292, %8, %cst_68 {dimension_numbers = #tpu.dot_dimension_numbers<[1], [0], [0], [1], [0, 0, 1, 1], [], []>} : vector<2x32xf32>, vector<32x128xf32>, vector<2x128xf32> -> vector<2x128xf32>
    %cst_69 = arith.constant dense<0.000000e+00> : vector<2x128xf32>
    %294 = tpu.matmul %269, %9, %cst_69 {dimension_numbers = #tpu.dot_dimension_numbers<[1], [0], [0], [1], [0, 0, 1, 1], [], []>} : vector<2x32xf32>, vector<32x128xf32>, vector<2x128xf32> -> vector<2x128xf32>
    %295 = arith.addf %293, %294 : vector<2x128xf32>
    %296 = arith.addf %295, %12 : vector<2x128xf32>
    %297 = vector.extract_strided_slice %296 {offsets = [0, 0], sizes = [2, 96], strides = [1, 1]} : vector<2x128xf32> to vector<2x96xf32>
    %298 = arith.negf %297 : vector<2x96xf32>
    %299 = math.exp %298 : vector<2x96xf32>
    %cst_70 = arith.constant 1.000000e+00 : f32
    %300 = vector.broadcast %cst_70 : f32 to vector<2x96xf32>
    %301 = arith.addf %300, %299 : vector<2x96xf32>
    %302 = arith.divf %300, %301 : vector<2x96xf32>
    %303 = vector.extract_strided_slice %296 {offsets = [0, 96], sizes = [2, 32], strides = [1, 1]} : vector<2x128xf32> to vector<2x32xf32>
    %304 = math.tanh %303 : vector<2x32xf32>
    %305 = vector.extract_strided_slice %302 {offsets = [0, 0], sizes = [2, 32], strides = [1, 1]} : vector<2x96xf32> to vector<2x32xf32>
    %306 = vector.extract_strided_slice %302 {offsets = [0, 32], sizes = [2, 32], strides = [1, 1]} : vector<2x96xf32> to vector<2x32xf32>
    %307 = vector.extract_strided_slice %302 {offsets = [0, 64], sizes = [2, 32], strides = [1, 1]} : vector<2x96xf32> to vector<2x32xf32>
    %308 = arith.mulf %306, %267 : vector<2x32xf32>
    %309 = arith.mulf %305, %304 : vector<2x32xf32>
    %310 = arith.addf %308, %309 : vector<2x32xf32>
    %311 = math.tanh %310 : vector<2x32xf32>
    %312 = arith.mulf %307, %311 : vector<2x32xf32>
    %313 = arith.index_cast %272 : i32 to index
    %c0_71 = arith.constant 0 : index
    %314 = vector.load %arg13[%313, %c0_71] : memref<16x32xf32, #tpu.memory_space<vmem>>, vector<2x32xf32>
    tpu.vector_store %arg13[%313, %c0_71], %312 {strides = array<i32>} : memref<16x32xf32, #tpu.memory_space<vmem>>, vector<2x32xf32>,
    %c7_i32 = arith.constant 7 : i32
    %c2_i32_72 = arith.constant 2 : i32
    %315 = arith.muli %c7_i32, %c2_i32_72 : i32
    %316 = arith.index_cast %315 : i32 to index
    %c0_73 = arith.constant 0 : index
    %317 = vector.load %arg12[%316, %c0_73] : memref<16x128xf32, #tpu.memory_space<vmem>>, vector<2x128xf32>
    %cst_74 = arith.constant dense<0.000000e+00> : vector<2x128xf32>
    %318 = tpu.matmul %292, %7, %cst_74 {dimension_numbers = #tpu.dot_dimension_numbers<[1], [0], [0], [1], [0, 0, 1, 1], [], []>} : vector<2x32xf32>, vector<32x128xf32>, vector<2x128xf32> -> vector<2x128xf32>
    %319 = arith.addf %317, %318 : vector<2x128xf32>
    %320 = vector.extract_strided_slice %319 {offsets = [0, 0], sizes = [2, 96], strides = [1, 1]} : vector<2x128xf32> to vector<2x96xf32>
    %321 = arith.negf %320 : vector<2x96xf32>
    %322 = math.exp %321 : vector<2x96xf32>
    %cst_75 = arith.constant 1.000000e+00 : f32
    %323 = vector.broadcast %cst_75 : f32 to vector<2x96xf32>
    %324 = arith.addf %323, %322 : vector<2x96xf32>
    %325 = arith.divf %323, %324 : vector<2x96xf32>
    %326 = vector.extract_strided_slice %319 {offsets = [0, 96], sizes = [2, 32], strides = [1, 1]} : vector<2x128xf32> to vector<2x32xf32>
    %327 = math.tanh %326 : vector<2x32xf32>
    %328 = vector.extract_strided_slice %325 {offsets = [0, 0], sizes = [2, 32], strides = [1, 1]} : vector<2x96xf32> to vector<2x32xf32>
    %329 = vector.extract_strided_slice %325 {offsets = [0, 32], sizes = [2, 32], strides = [1, 1]} : vector<2x96xf32> to vector<2x32xf32>
    %330 = vector.extract_strided_slice %325 {offsets = [0, 64], sizes = [2, 32], strides = [1, 1]} : vector<2x96xf32> to vector<2x32xf32>
    %331 = arith.mulf %329, %290 : vector<2x32xf32>
    %332 = arith.mulf %328, %327 : vector<2x32xf32>
    %333 = arith.addf %331, %332 : vector<2x32xf32>
    %334 = math.tanh %333 : vector<2x32xf32>
    %335 = arith.mulf %330, %334 : vector<2x32xf32>
    %cst_76 = arith.constant dense<0.000000e+00> : vector<2x128xf32>
    %336 = tpu.matmul %335, %8, %cst_76 {dimension_numbers = #tpu.dot_dimension_numbers<[1], [0], [0], [1], [0, 0, 1, 1], [], []>} : vector<2x32xf32>, vector<32x128xf32>, vector<2x128xf32> -> vector<2x128xf32>
    %cst_77 = arith.constant dense<0.000000e+00> : vector<2x128xf32>
    %337 = tpu.matmul %312, %9, %cst_77 {dimension_numbers = #tpu.dot_dimension_numbers<[1], [0], [0], [1], [0, 0, 1, 1], [], []>} : vector<2x32xf32>, vector<32x128xf32>, vector<2x128xf32> -> vector<2x128xf32>
    %338 = arith.addf %336, %337 : vector<2x128xf32>
    %339 = arith.addf %338, %12 : vector<2x128xf32>
    %340 = vector.extract_strided_slice %339 {offsets = [0, 0], sizes = [2, 96], strides = [1, 1]} : vector<2x128xf32> to vector<2x96xf32>
    %341 = arith.negf %340 : vector<2x96xf32>
    %342 = math.exp %341 : vector<2x96xf32>
    %cst_78 = arith.constant 1.000000e+00 : f32
    %343 = vector.broadcast %cst_78 : f32 to vector<2x96xf32>
    %344 = arith.addf %343, %342 : vector<2x96xf32>
    %345 = arith.divf %343, %344 : vector<2x96xf32>
    %346 = vector.extract_strided_slice %339 {offsets = [0, 96], sizes = [2, 32], strides = [1, 1]} : vector<2x128xf32> to vector<2x32xf32>
    %347 = math.tanh %346 : vector<2x32xf32>
    %348 = vector.extract_strided_slice %345 {offsets = [0, 0], sizes = [2, 32], strides = [1, 1]} : vector<2x96xf32> to vector<2x32xf32>
    %349 = vector.extract_strided_slice %345 {offsets = [0, 32], sizes = [2, 32], strides = [1, 1]} : vector<2x96xf32> to vector<2x32xf32>
    %350 = vector.extract_strided_slice %345 {offsets = [0, 64], sizes = [2, 32], strides = [1, 1]} : vector<2x96xf32> to vector<2x32xf32>
    %351 = arith.mulf %349, %310 : vector<2x32xf32>
    %352 = arith.mulf %348, %347 : vector<2x32xf32>
    %353 = arith.addf %351, %352 : vector<2x32xf32>
    %354 = math.tanh %353 : vector<2x32xf32>
    %355 = arith.mulf %350, %354 : vector<2x32xf32>
    %356 = arith.index_cast %315 : i32 to index
    %c0_79 = arith.constant 0 : index
    %357 = vector.load %arg13[%356, %c0_79] : memref<16x32xf32, #tpu.memory_space<vmem>>, vector<2x32xf32>
    tpu.vector_store %arg13[%356, %c0_79], %355 {strides = array<i32>} : memref<16x32xf32, #tpu.memory_space<vmem>>, vector<2x32xf32>,
    %c8_i32 = arith.constant 8 : i32
    %c0_80 = arith.constant 0 : index
    %c0_81 = arith.constant 0 : index
    %c0_82 = arith.constant 0 : index
    %358 = vector.load %arg10[%c0_80, %c0_81, %c0_82] : memref<2x2x32xf32, #tpu.memory_space<vmem>>, vector<1x2x32xf32>
    %359 = vector.shape_cast %358 : vector<1x2x32xf32> to vector<2x32xf32>
    %360 = vector.shape_cast %335 : vector<2x32xf32> to vector<1x2x32xf32>
    tpu.vector_store %arg10[%c0_80, %c0_81, %c0_82], %360 {strides = array<i32>} : memref<2x2x32xf32, #tpu.memory_space<vmem>>, vector<1x2x32xf32>,
    %c1 = arith.constant 1 : index
    %c0_83 = arith.constant 0 : index
    %c0_84 = arith.constant 0 : index
    %361 = vector.load %arg10[%c1, %c0_83, %c0_84] : memref<2x2x32xf32, #tpu.memory_space<vmem>>, vector<1x2x32xf32>
    %362 = vector.shape_cast %361 : vector<1x2x32xf32> to vector<2x32xf32>
    %363 = vector.shape_cast %355 : vector<2x32xf32> to vector<1x2x32xf32>
    tpu.vector_store %arg10[%c1, %c0_83, %c0_84], %363 {strides = array<i32>} : memref<2x2x32xf32, #tpu.memory_space<vmem>>, vector<1x2x32xf32>,
    %c0_85 = arith.constant 0 : index
    %c0_86 = arith.constant 0 : index
    %c0_87 = arith.constant 0 : index
    %364 = vector.load %arg11[%c0_85, %c0_86, %c0_87] : memref<2x2x32xf32, #tpu.memory_space<vmem>>, vector<1x2x32xf32>
    %365 = vector.shape_cast %364 : vector<1x2x32xf32> to vector<2x32xf32>
    %366 = vector.shape_cast %333 : vector<2x32xf32> to vector<1x2x32xf32>
    tpu.vector_store %arg11[%c0_85, %c0_86, %c0_87], %366 {strides = array<i32>} : memref<2x2x32xf32, #tpu.memory_space<vmem>>, vector<1x2x32xf32>,
    %c1_88 = arith.constant 1 : index
    %c0_89 = arith.constant 0 : index
    %c0_90 = arith.constant 0 : index
    %367 = vector.load %arg11[%c1_88, %c0_89, %c0_90] : memref<2x2x32xf32, #tpu.memory_space<vmem>>, vector<1x2x32xf32>
    %368 = vector.shape_cast %367 : vector<1x2x32xf32> to vector<2x32xf32>
    %369 = vector.shape_cast %353 : vector<2x32xf32> to vector<1x2x32xf32>
    tpu.vector_store %arg11[%c1_88, %c0_89, %c0_90], %369 {strides = array<i32>} : memref<2x2x32xf32, #tpu.memory_space<vmem>>, vector<1x2x32xf32>,
    %c0_91 = arith.constant 0 : index
    %c0_92 = arith.constant 0 : index
    %370 = vector.load %arg13[%c0_91, %c0_92] : memref<16x32xf32, #tpu.memory_space<vmem>>, vector<16x32xf32>
    %c0_93 = arith.constant 0 : index
    %c0_94 = arith.constant 0 : index
    %371 = vector.load %arg7[%c0_93, %c0_94] : memref<32x128xf32, #tpu.memory_space<vmem>>, vector<32x128xf32>
    %cst_95 = arith.constant dense<0.000000e+00> : vector<16x128xf32>
    %372 = tpu.matmul %370, %371, %cst_95 {dimension_numbers = #tpu.dot_dimension_numbers<[1], [0], [0], [1], [0, 0, 1, 1], [], []>} : vector<16x32xf32>, vector<32x128xf32>, vector<16x128xf32> -> vector<16x128xf32>
    %c0_96 = arith.constant 0 : index
    %c0_97 = arith.constant 0 : index
    %373 = vector.load %arg8[%c0_96, %c0_97] : memref<1x128xf32, #tpu.memory_space<vmem>>, vector<1x128xf32>
    %374 = vector.broadcast %373 : vector<1x128xf32> to vector<16x128xf32>
    %375 = arith.addf %372, %374 : vector<16x128xf32>
    %c0_98 = arith.constant 0 : index
    %c0_99 = arith.constant 0 : index
    %376 = vector.load %arg9[%c0_98, %c0_99] : memref<16x128xf32, #tpu.memory_space<vmem>>, vector<16x128xf32>
    tpu.vector_store %arg9[%c0_98, %c0_99], %375 {strides = array<i32>} : memref<16x128xf32, #tpu.memory_space<vmem>>, vector<16x128xf32>,
    return
  }
}

</mosaic_0001>

<bundles_post_ra>
// kernel: text_generation_forward.1
= control target key start
LH: loop header
LB: loop body
LE: loop exit
PB: predicated region body
PF: predicated region fallthrough
CT: control target
= control target key end

     0   :  { %17 = vsyncpa [#allocation5], 0  ;;  %vm48_vm0 = vcmask 130048   ;;  %v3283_v4 = vmov 0.0|0.0   ;;  %vm3284_vm1 = vmmov 0   ;;  %v3285_v10 = vmov 0.0   ;;  %s3777_s0 = inlined_call_operand.vmem [shape: f32[16,16], index: 0, kind: input, shape index: {}]   ;;  %s3778_s1 = inlined_call_operand.vmem [shape: f32[16,128], index: 1, kind: input, shape index: {}]   ;;  %s3779_s2 = inlined_call_operand.vmem [shape: f32[32,128], index: 2, kind: input, shape index: {}]   ;;  %s3780_s3 = inlined_call_operand.vmem [shape: f32[1,128], index: 3, kind: input, shape index: {}]   ;;  %s3781_s4 = inlined_call_operand.vmem [shape: f32[32,128], index: 4, kind: input, shape index: {}]   ;;  %s3782_s5 = inlined_call_operand.vmem [shape: f32[32,128], index: 5, kind: input, shape index: {}]   ;;  %s3783_s6 = inlined_call_operand.vmem [shape: f32[1,128], index: 6, kind: input, shape index: {}]   ;;  %s3784_s7 = inlined_call_operand.vmem [shape: f32[32,128], index: 7, kind: input, shape index: {}]   ;;  %s3785_s8 = inlined_call_operand.vmem [shape: f32[1,128], index: 8, kind: input, shape index: {}]   ;;  %s3786_s9 = inlined_call_operand.vmem [shape: f32[16,128], index: 9, kind: output, shape index: {0}]   ;;  %s3787_s10 = inlined_call_operand.hbm [shape: f32[2,2,32], index: 10, kind: output, shape index: {1}]   ;;  %s3788_s11 = inlined_call_operand.hbm [shape: f32[2,2,32], index: 11, kind: output, shape index: {2}]  }
   0x1   :  { %v39_v0 = vld [vmem:[%s3778_s1] sm:$0xff]  ;;  %v40_v1 = vld [vmem:[%s3778_s1 + $0x8] sm:$0xff]  ;;  %2946 = vmatprep.subr.bf16.mxu1 %v3283_v4  ;;  %v134_v8 = vld [vmem:[%s3779_s2 + $0x10] sm:$0xff]  ;;  %2675 = vmatprep.mubr.msk.f32.mxu1 %vm3284_vm1, %v3285_v10 }
   0x2   :  { %v37_v2 = vld [vmem:[%s3777_s0] sm:$0xff]  ;;  %v2942_v3 = vpack.c.bf16 %v40_v1, %v39_v0  ;;  %v133_v6 = vld [vmem:[%s3779_s2 + $0x8] sm:$0xff]  ;;  %v135_v9 = vld [vmem:[%s3779_s2 + $0x18] sm:$0xff] }
   0x3   :  { %2664 = vmatprep.mubr.msk.f32.mxu0 %vm48_vm0, %v37_v2  ;;  %v132_v5 = vld [vmem:[%s3779_s2] sm:$0xff] }
   0x4   :  { %v3369_v7 = vpack.c.bf16 %v133_v6, %v132_v5 }
   0x5   :  { %18 = vsyncpa [#allocation7], 0  ;;  %2943 = vmatprep.subr.bf16.mxu0 %v2942_v3  ;;  %v38_v11 = vld [vmem:[%s3777_s0 + $0x8] sm:$0xff]  ;;  %v3383_v12 = vpack.c.bf16 %v135_v9, %v134_v8  ;;  %v2485_v13 = vld [vmem:[%s3780_s3] ss:$0 sm:$0xff]  ;;  %s3286_s13 = smov 32  }
   0x6   :  { %2945 = vmatpush3.bf16.msra.mxu0 %v2942_v3  ;;  %2948 = vmatpush3.bf16.msra.mxu1 %v3369_v7  ;;  %v140_v32 = vld [vmem:[%s3782_s5] sm:$0xff]  ;;  %v141_v33 = vld [vmem:[%s3782_s5 + $0x8] sm:$0xff]  ;;  %v142_v34 = vld [vmem:[%s3782_s5 + $0x10] sm:$0xff]  ;;  %vm152_vm2 = vcmask 261120   ;;  %vm425_vm3 = vcmask 254976   ;;  %s3290_s17 = smov [#allocation6]  }
   0x7   :  { %2949 = vmatprep.subr.bf16.mxu1 %v3283_v4  ;;  %2952 = vmatprep.subr.bf16.mxu0 %v3283_v4  ;;  %v3412_v35 = vpack.c.bf16 %v141_v33, %v140_v32  ;;  %v143_v36 = vld [vmem:[%s3782_s5 + $0x18] sm:$0xff]  ;;  %v136_v37 = vld [vmem:[%s3781_s4] sm:$0xff]  ;;  %v137_v38 = vld [vmem:[%s3781_s4 + $0x8] sm:$0xff]  ;;  %s2468_s18 = sshll.u32 %s3290_s17, 4  ;;  %s2469_s18 = int_to_ptr.vmem [resolvable:$true] %s2468_s18 }
   0x8   :  { %v3423_v39 = vpack.c.bf16 %v137_v38, %v136_v37  ;;  %v138_v40 = vld [vmem:[%s3781_s4 + $0x10] sm:$0xff]  ;;  %v139_v41 = vld [vmem:[%s3781_s4 + $0x18] sm:$0xff]  ;;  %v3432_v42 = vpack.c.bf16 %v143_v36, %v142_v34  ;;  %s3287_s4 = smov 64   ;;  %v3469_v50 = vld [vmem:[%s3783_s6] ss:$0 sm:$0xff]  ;;  %s3288_s6 = smov 96  }
   0x9   :  { %2665 = vmatmul.mubr.msk.f32.vlgmr.msra.gmra.mrb[0].mxu0 %vm48_vm0, %v38_v11  ;;  %v3436_v43 = vpack.c.bf16 %v139_v41, %v138_v40 }
   0xa   :  { %2951 = vmatpush3.bf16.msra.mxu1 %v3383_v12  ;;  %2686 = vmatprep.mubr.msk.f32.mxu0 %vm3284_vm1, %v3285_v10 }
   0xb   :  { %2958 = vmatprep.subr.bf16.mxu1 %v3283_v4  ;;  %2954 = vmatpush3.bf16.msra.mxu0 %v3412_v35 }
   0xc   :  { %2955 = vmatprep.subr.bf16.mxu0 %v3283_v4 }
   0xd   :  { %2676 = vmatmul.mubr.f32.vlgmr.msra.gmra.mrb[0].mxu1 %v3285_v10 }
   0xe   :  { %2697 = vmatprep.mubr.msk.f32.mxu1 %vm3284_vm1, %v3285_v10  ;;  %2960 = vmatpush3.bf16.msra.mxu1 %v3423_v39 }
   0xf   :  { %2961 = vmatprep.subr.bf16.mxu1 %v3283_v4  ;;  %2957 = vmatpush3.bf16.msra.mxu0 %v3432_v42 }
  0x10   :  { %2964 = vmatprep.subr.bf16.mxu0 %v3283_v4 }
  0x12   :  { %2963 = vmatpush3.bf16.msra.mxu1 %v3436_v43  ;;  %2687 = vmatmul.mubr.f32.vlgmr.msra.gmra.mrb[2].mxu0 %v3285_v10 }
  0x13   :  { %2970 = vmatprep.subr.bf16.mxu1 %v3283_v4  ;;  %2966 = vmatpush3.bf16.msra.mxu0 %v3369_v7 }
  0x14   :  { %2967 = vmatprep.subr.bf16.mxu0 %v3283_v4  ;;  %2708 = vmatprep.mubr.msk.f32.mxu0 %vm3284_vm1, %v3285_v10 }
  0x17   :  { %2969 = vmatpush3.bf16.msra.mxu0 %v3383_v12 }
  0x18   :  { %2976 = vmatprep.subr.bf16.mxu0 %v3283_v4 }
  0xdc   :  { %v2666_v14 = vpop.f32.mrb[0].mxu0 }
  0xdd   :  { %v127_v15 = vadd.f32 %v2666_v14, %v2485_v13  ;;  %v121_v16 = vpop.f32.mrb[1].mxu0 }
  0xde   :  { %v122_v17 = vadd.f32 %v2485_v13, %v121_v16 }
  0xdf   :  { %131 = vst [vmem:[#allocation2 + $0x8] sm:$0xff] %v127_v15 }
  0xe0   :  { %130 = vst [vmem:[#allocation2] sm:$0xff] %v122_v17  ;;  %v222_v18 = vpop.f32.mrb[0].mxu1 }
  0xe1   :  { %v2677_v19 = vpop.f32.mrb[1].mxu1 }
  0xe5   :  { %v317_v47 = vpop.f32.mrb[2].mxu0 }
  0xe6   :  { %v2688_v48 = vpop.f32.mrb[3].mxu0 }
  0xe7   :  { %v151_v20 = vld [vmem:[#allocation2] sm:$0x3]  ;;  %v427_v52 = vld [vmem:[#allocation2 + $0x2] sm:$0x3]  ;;  %v700_v33 = vld [vmem:[#allocation2 + $0x4] sm:$0x3] }
  0xe8   :  { %v226_v21 = vadd.f32 %v222_v18, %v151_v20 }
  0xea   :  { %3107 = vtanh.f32 %v226_v21  ;;  %v2489_v23 = vmul.f32 -1.442695, %v226_v21 }
  0xec   :  { %3109 = vpow2.f32 %v2489_v23 }
  0xf4   :  { %v3108_v22 = vpop.eup %3107 }
  0xf5   :  { %236 = vrot.lane.b32.xlu0 %v3108_v22, %s3286_s13 }
  0xf6   :  { %v3110_v24 = vpop.eup %3109 }
  0xf7   :  { %v230_v25 = vadd.f32 1.0, %v3110_v24 }
  0xf9   :  { %3111 = vrcp.f32 %v230_v25 }
 0x103   :  { %v3112_v26 = vpop.eup %3111 }
 0x104   :  { %v234_v29 = vmul.f32 0.0, %v3112_v26 }
 0x167   :  { %v237_v27 = vpop.permute.xlu0 %236 }
 0x168   :  { %v239_v28 = vmul.f32 %v3112_v26, %v237_v27 }
 0x16a   :  { %241 = vrot.lane.b32.xlu0 %v239_v28, %s3286_s13 }
 0x1dc   :  { %v242_v30 = vpop.permute.xlu0 %241 }
 0x1dd   :  { %v3400_v31 = vadd.f32 %v242_v30, %v234_v29 }
 0x1df   :  { %3113 = vtanh.f32 %v3400_v31 }
 0x1e9   :  { %v3114_v44 = vpop.eup %3113 }
 0x1ea   :  { %247 = vrot.lane.b32.xlu1 %v3114_v44, %s3286_s13 }
 0x25c   :  { %v248_v45 = vpop.permute.xlu1 %247 }
 0x25d   :  { %v250_v46 = vmul.f32 %v3112_v26, %v248_v45 }
 0x25f   :  { %322 = vrot.lane.b32.xlu1 %v250_v46, %s3287_s4 }
 0x2d1   :  { %v323_v49 = vpop.permute.xlu1 %322 }
 0x2d2   :  { %2698 = vmatmul.mubr.msk.f32.vlgmr.msra.gmra.mrb[2].mxu1 %vm152_vm2, %v323_v49  ;;  %2709 = vmatmul.mubr.msk.f32.vlgmr.msra.gmra.mrb[4].mxu0 %vm152_vm2, %v323_v49 }
 0x2d3   :  { %2978 = vmatpush3.bf16.msra.mxu0 %v3423_v39  ;;  %2972 = vmatpush3.bf16.msra.mxu1 %v3412_v35 }
 0x2d4   :  { %2979 = vmatprep.subr.bf16.mxu0 %v3283_v4  ;;  %2973 = vmatprep.subr.bf16.mxu1 %v3283_v4 }
 0x2d5   :  { %2730 = vmatprep.mubr.msk.f32.mxu0 %vm3284_vm1, %v3285_v10  ;;  %2719 = vmatprep.mubr.msk.f32.mxu1 %vm3284_vm1, %v3285_v10 }
 0x2d7   :  { %2981 = vmatpush3.bf16.msra.mxu0 %v3436_v43  ;;  %2975 = vmatpush3.bf16.msra.mxu1 %v3432_v42 }
 0x2d8   :  { %2982 = vmatprep.subr.bf16.mxu1 %v3283_v4  ;;  %2988 = vmatprep.subr.bf16.mxu0 %v3283_v4 }
 0x3a5   :  { %v392_v51 = vpop.f32.mrb[2].mxu1  ;;  %v494_v53 = vpop.f32.mrb[4].mxu0 }
 0x3a6   :  { %v393_v54 = vadd.f32 %v392_v51, %v317_v47  ;;  %v498_v55 = vadd.f32 %v494_v53, %v427_v52  ;;  %v2699_v56 = vpop.f32.mrb[3].mxu1  ;;  %v2710_v57 = vpop.f32.mrb[5].mxu0 }
 0x3a8   :  { %v396_v58 = vadd.f32 %v3469_v50, %v393_v54  ;;  %3115 = vtanh.f32 %v498_v55  ;;  %v2493_v61 = vmul.f32 -1.442695, %v498_v55 }
 0x3aa   :  { %3117 = vtanh.f32 %v396_v58  ;;  %v2491_v62 = vmul.f32 -1.442695, %v396_v58 }
 0x3ab   :  { %3119 = vpow2.f32 %v2493_v61 }
 0x3ac   :  { %3121 = vpow2.f32 %v2491_v62 }
 0x3b2   :  { %v3116_v59 = vpop.eup %3115 }
 0x3b3   :  { %508 = vrot.lane.b32.xlu1 %v3116_v59, %s3286_s13 }
 0x3b4   :  { %v3118_v60 = vpop.eup %3117 }
 0x3b5   :  { %406 = vrot.lane.b32.xlu0 %v3118_v60, %s3286_s13  ;;  %v3120_v63 = vpop.eup %3119 }
 0x3b6   :  { %v3122_v0 = vpop.eup %3121  ;;  %v502_v1 = vadd.f32 1.0, %v3120_v63 }
 0x3b7   :  { %v400_v2 = vadd.f32 1.0, %v3122_v0 }
 0x3b8   :  { %3123 = vrcp.f32 %v502_v1 }
 0x3b9   :  { %3125 = vrcp.f32 %v400_v2 }
 0x3c2   :  { %v3124_v3 = vpop.eup %3123 }
 0x3c3   :  { %v3126_v8 = vpop.eup %3125  ;;  %v506_v13 = vmul.f32 %v3124_v3, %v3400_v31 }
 0x3c4   :  { %v404_v16 = vmul.f32 0.0, %v3126_v8 }
 0x425   :  { %v509_v5 = vpop.permute.xlu1 %508 }
 0x426   :  { %v511_v6 = vmul.f32 %v3124_v3, %v509_v5 }
 0x427   :  { %v407_v9 = vpop.permute.xlu0 %406 }
 0x428   :  { %v409_v11 = vmul.f32 %v3126_v8, %v407_v9  ;;  %513 = vrot.lane.b32.xlu1 %v511_v6, %s3286_s13 }
 0x42a   :  { %411 = vrot.lane.b32.xlu0 %v409_v11, %s3286_s13 }
 0x49a   :  { %v514_v14 = vpop.permute.xlu1 %513 }
 0x49b   :  { %v3477_v15 = vadd.f32 %v514_v14, %v506_v13 }
 0x49c   :  { %v412_v17 = vpop.permute.xlu0 %411 }
 0x49d   :  { %3127 = vtanh.f32 %v3477_v15  ;;  %v3480_v18 = vadd.f32 %v412_v17, %v404_v16 }
 0x49f   :  { %3129 = vtanh.f32 %v3480_v18 }
 0x4a7   :  { %v3128_v19 = vpop.eup %3127 }
 0x4a8   :  { %519 = vrot.lane.b32.xlu1 %v3128_v19, %s3286_s13 }
 0x4a9   :  { %v3130_v20 = vpop.eup %3129 }
 0x4aa   :  { %417 = vrot.lane.b32.xlu0 %v3130_v20, %s3286_s13 }
 0x51a   :  { %v520_v21 = vpop.permute.xlu1 %519 }
 0x51b   :  { %v522_v22 = vmul.f32 %v3124_v3, %v520_v21 }
 0x51c   :  { %v418_v23 = vpop.permute.xlu0 %417 }
 0x51d   :  { %v420_v24 = vmul.f32 %v3126_v8, %v418_v23  ;;  %596 = vrot.lane.b32.xlu1 %v522_v22, %s3287_s4 }
 0x51f   :  { %422 = vrot.lane.b32.xlu0 %v420_v24, %s3287_s4 }
 0x58f   :  { %v597_v25 = vpop.permute.xlu1 %596 }
 0x590   :  { %2731 = vmatmul.mubr.msk.f32.vlgmr.msra.gmra.mrb[6].mxu0 %vm152_vm2, %v597_v25 }
 0x591   :  { %v423_v26 = vpop.permute.xlu0 %422  ;;  %2990 = vmatpush3.bf16.msra.mxu0 %v3412_v35  ;;  %2752 = vmatprep.mubr.msk.f32.mxu0 %vm3284_vm1, %v3285_v10 }
 0x592   :  { %426 = vst.msk [vmem:[#allocation3] sm:$0x3] %vm425_vm3, %v423_v26  ;;  %2720 = vmatmul.mubr.msk.f32.vlgmr.msra.gmra.mrb[4].mxu1 %vm152_vm2, %v423_v26  ;;  %2991 = vmatprep.subr.bf16.mxu0 %v3283_v4 }
 0x593   :  { %2984 = vmatpush3.bf16.msra.mxu1 %v3369_v7  ;;  %2741 = vmatprep.mubr.msk.f32.mxu1 %vm3284_vm1, %v3285_v10 }
 0x594   :  { %2985 = vmatprep.subr.bf16.mxu1 %v3283_v4 }
 0x595   :  { %2993 = vmatpush3.bf16.msra.mxu0 %v3432_v42 }
 0x596   :  { %3000 = vmatprep.subr.bf16.mxu0 %v3283_v4 }
 0x597   :  { %2987 = vmatpush3.bf16.msra.mxu1 %v3383_v12 }
 0x598   :  { %2994 = vmatprep.subr.bf16.mxu1 %v3283_v4 }
 0x59a   :  { %2742 = vmatmul.mubr.msk.f32.vlgmr.msra.gmra.mrb[6].mxu1 %vm152_vm2, %v597_v25 }
 0x59b   :  { %2996 = vmatpush3.bf16.msra.mxu1 %v3423_v39  ;;  %2763 = vmatprep.mubr.msk.f32.mxu1 %vm3284_vm1, %v3285_v10 }
 0x59c   :  { %2997 = vmatprep.subr.bf16.mxu1 %v3283_v4 }
 0x59f   :  { %2999 = vmatpush3.bf16.msra.mxu1 %v3436_v43 }
 0x5a0   :  { %3006 = vmatprep.subr.bf16.mxu1 %v3283_v4 }
 0x663   :  { %v666_v27 = vpop.f32.mrb[6].mxu0 }
 0x664   :  { %v2732_v28 = vpop.f32.mrb[7].mxu0 }
 0x665   :  { %v591_v29 = vpop.f32.mrb[4].mxu1 }
 0x666   :  { %v667_v30 = vadd.f32 %v666_v27, %v591_v29  ;;  %v2721_v31 = vpop.f32.mrb[5].mxu1 }
 0x668   :  { %v670_v32 = vadd.f32 %v3469_v50, %v667_v30 }
 0x66a   :  { %3131 = vtanh.f32 %v670_v32  ;;  %v2496_v41 = vmul.f32 -1.442695, %v670_v32 }
 0x66d   :  { %v767_v34 = vpop.f32.mrb[6].mxu1 }
 0x66e   :  { %v771_v36 = vadd.f32 %v767_v34, %v700_v33  ;;  %v2743_v37 = vpop.f32.mrb[7].mxu1 }
 0x670   :  { %3133 = vtanh.f32 %v771_v36  ;;  %v2498_v44 = vmul.f32 -1.442695, %v771_v36 }
 0x671   :  { %3135 = vpow2.f32 %v2496_v41 }
 0x672   :  { %3137 = vpow2.f32 %v2498_v44 }
 0x674   :  { %v3132_v38 = vpop.eup %3131 }
 0x675   :  { %680 = vrot.lane.b32.xlu0 %v3132_v38, %s3286_s13 }
 0x67a   :  { %v3134_v40 = vpop.eup %3133 }
 0x67b   :  { %781 = vrot.lane.b32.xlu1 %v3134_v40, %s3286_s13  ;;  %v3136_v45 = vpop.eup %3135 }
 0x67c   :  { %v674_v46 = vadd.f32 1.0, %v3136_v45  ;;  %v3138_v47 = vpop.eup %3137 }
 0x67d   :  { %v775_v48 = vadd.f32 1.0, %v3138_v47 }
 0x67e   :  { %3139 = vrcp.f32 %v674_v46 }
 0x67f   :  { %3141 = vrcp.f32 %v775_v48 }
 0x688   :  { %v3140_v49 = vpop.eup %3139 }
 0x689   :  { %v3142_v53 = vpop.eup %3141  ;;  %v678_v56 = vmul.f32 %v3140_v49, %v3480_v18 }
 0x68a   :  { %v779_v59 = vmul.f32 %v3142_v53, %v3477_v15  ;;  %v973_v15 = vld [vmem:[#allocation2 + $0x6] sm:$0x3] }
 0x6e7   :  { %v681_v51 = vpop.permute.xlu0 %680 }
 0x6e8   :  { %v683_v52 = vmul.f32 %v3140_v49, %v681_v51 }
 0x6ea   :  { %685 = vrot.lane.b32.xlu0 %v683_v52, %s3286_s13 }
 0x6ed   :  { %v782_v54 = vpop.permute.xlu1 %781 }
 0x6ee   :  { %v784_v55 = vmul.f32 %v3142_v53, %v782_v54 }
 0x6f0   :  { %786 = vrot.lane.b32.xlu1 %v784_v55, %s3286_s13 }
 0x75c   :  { %v686_v57 = vpop.permute.xlu0 %685 }
 0x75d   :  { %v3515_v58 = vadd.f32 %v686_v57, %v678_v56 }
 0x75f   :  { %3143 = vtanh.f32 %v3515_v58 }
 0x762   :  { %v787_v60 = vpop.permute.xlu1 %786 }
 0x763   :  { %v3519_v61 = vadd.f32 %v787_v60, %v779_v59  ;;  %v1246_v59 = vld [vmem:[#allocation2 + $0x8] sm:$0x3] }
 0x765   :  { %3145 = vtanh.f32 %v3519_v61 }
 0x769   :  { %v3144_v62 = vpop.eup %3143 }
 0x76a   :  { %691 = vrot.lane.b32.xlu0 %v3144_v62, %s3286_s13 }
 0x76f   :  { %v3146_v63 = vpop.eup %3145 }
 0x770   :  { %792 = vrot.lane.b32.xlu1 %v3146_v63, %s3286_s13 }
 0x7dc   :  { %v692_v0 = vpop.permute.xlu0 %691 }
 0x7dd   :  { %v694_v1 = vmul.f32 %v3140_v49, %v692_v0 }
 0x7df   :  { %696 = vrot.lane.b32.xlu0 %v694_v1, %s3287_s4 }
 0x7e2   :  { %v793_v2 = vpop.permute.xlu1 %792 }
 0x7e3   :  { %v795_v3 = vmul.f32 %v3142_v53, %v793_v2 }
 0x7e5   :  { %869 = vrot.lane.b32.xlu1 %v795_v3, %s3287_s4 }
 0x851   :  { %v697_v5 = vpop.permute.xlu0 %696 }
 0x852   :  { %699 = vst.msk [vmem:[#allocation3 + $0x2] sm:$0x3] %vm425_vm3, %v697_v5  ;;  %2753 = vmatmul.mubr.msk.f32.vlgmr.msra.gmra.mrb[8].mxu0 %vm152_vm2, %v697_v5 }
 0x853   :  { %3002 = vmatpush3.bf16.msra.mxu0 %v3369_v7  ;;  %2774 = vmatprep.mubr.msk.f32.mxu0 %vm3284_vm1, %v3285_v10 }
 0x854   :  { %3003 = vmatprep.subr.bf16.mxu0 %v3283_v4 }
 0x857   :  { %3005 = vmatpush3.bf16.msra.mxu0 %v3383_v12  ;;  %v870_v6 = vpop.permute.xlu1 %869 }
 0x858   :  { %2764 = vmatmul.mubr.msk.f32.vlgmr.msra.gmra.mrb[8].mxu1 %vm152_vm2, %v870_v6  ;;  %3012 = vmatprep.subr.bf16.mxu0 %v3283_v4 }
 0x859   :  { %3008 = vmatpush3.bf16.msra.mxu1 %v3412_v35  ;;  %2785 = vmatprep.mubr.msk.f32.mxu1 %vm3284_vm1, %v3285_v10 }
 0x85a   :  { %2775 = vmatmul.mubr.msk.f32.vlgmr.msra.gmra.mrb[10].mxu0 %vm152_vm2, %v870_v6  ;;  %3009 = vmatprep.subr.bf16.mxu1 %v3283_v4 }
 0x85b   :  { %3014 = vmatpush3.bf16.msra.mxu0 %v3423_v39  ;;  %2796 = vmatprep.mubr.msk.f32.mxu0 %vm3284_vm1, %v3285_v10 }
 0x85c   :  { %3015 = vmatprep.subr.bf16.mxu0 %v3283_v4 }
 0x85d   :  { %3011 = vmatpush3.bf16.msra.mxu1 %v3432_v42 }
 0x85e   :  { %3018 = vmatprep.subr.bf16.mxu1 %v3283_v4 }
 0x85f   :  { %3017 = vmatpush3.bf16.msra.mxu0 %v3436_v43 }
 0x860   :  { %3024 = vmatprep.subr.bf16.mxu0 %v3283_v4 }
 0x925   :  { %v864_v8 = vpop.f32.mrb[8].mxu0 }
 0x926   :  { %v2754_v9 = vpop.f32.mrb[9].mxu0 }
 0x92b   :  { %v939_v11 = vpop.f32.mrb[8].mxu1 }
 0x92c   :  { %v940_v13 = vadd.f32 %v939_v11, %v864_v8  ;;  %v2765_v14 = vpop.f32.mrb[9].mxu1 }
 0x92d   :  { %v1040_v16 = vpop.f32.mrb[10].mxu0 }
 0x92e   :  { %v943_v17 = vadd.f32 %v3469_v50, %v940_v13  ;;  %v1044_v18 = vadd.f32 %v1040_v16, %v973_v15  ;;  %v2776_v19 = vpop.f32.mrb[11].mxu0 }
 0x930   :  { %3147 = vtanh.f32 %v943_v17  ;;  %v2501_v22 = vmul.f32 -1.442695, %v943_v17  ;;  %v2503_v23 = vmul.f32 -1.442695, %v1044_v18 }
 0x931   :  { %3149 = vtanh.f32 %v1044_v18 }
 0x932   :  { %3151 = vpow2.f32 %v2501_v22 }
 0x933   :  { %3153 = vpow2.f32 %v2503_v23 }
 0x93a   :  { %v3148_v20 = vpop.eup %3147 }
 0x93b   :  { %v3150_v21 = vpop.eup %3149  ;;  %953 = vrot.lane.b32.xlu0 %v3148_v20, %s3286_s13 }
 0x93c   :  { %1054 = vrot.lane.b32.xlu1 %v3150_v21, %s3286_s13  ;;  %v3152_v24 = vpop.eup %3151 }
 0x93d   :  { %v3154_v25 = vpop.eup %3153  ;;  %v947_v26 = vadd.f32 1.0, %v3152_v24 }
 0x93e   :  { %v1048_v27 = vadd.f32 1.0, %v3154_v25 }
 0x93f   :  { %3155 = vrcp.f32 %v947_v26 }
 0x940   :  { %3157 = vrcp.f32 %v1048_v27 }
 0x949   :  { %v3156_v28 = vpop.eup %3155 }
 0x94a   :  { %v3158_v30 = vpop.eup %3157  ;;  %v951_v34 = vmul.f32 %v3156_v28, %v3515_v58 }
 0x94b   :  { %v1052_v36 = vmul.f32 %v3158_v30, %v3519_v61 }
 0x9ad   :  { %v954_v29 = vpop.permute.xlu0 %953 }
 0x9ae   :  { %v1055_v31 = vpop.permute.xlu1 %1054  ;;  %v956_v32 = vmul.f32 %v3156_v28, %v954_v29 }
 0x9af   :  { %v1057_v33 = vmul.f32 %v3158_v30, %v1055_v31 }
 0x9b0   :  { %958 = vrot.lane.b32.xlu0 %v956_v32, %s3286_s13 }
 0x9b1   :  { %1059 = vrot.lane.b32.xlu1 %v1057_v33, %s3286_s13 }
 0xa22   :  { %v959_v37 = vpop.permute.xlu0 %958 }
 0xa23   :  { %v1060_v38 = vpop.permute.xlu1 %1059  ;;  %v3555_v40 = vadd.f32 %v959_v37, %v951_v34 }
 0xa24   :  { %v3557_v41 = vadd.f32 %v1060_v38, %v1052_v36  ;;  %v1519_v38 = vld [vmem:[#allocation2 + $0xa] sm:$0x3] }
 0xa25   :  { %3159 = vtanh.f32 %v3555_v40 }
 0xa26   :  { %3161 = vtanh.f32 %v3557_v41 }
 0xa2f   :  { %v3160_v44 = vpop.eup %3159 }
 0xa30   :  { %v3162_v45 = vpop.eup %3161  ;;  %964 = vrot.lane.b32.xlu0 %v3160_v44, %s3286_s13 }
 0xa31   :  { %1065 = vrot.lane.b32.xlu1 %v3162_v45, %s3286_s13 }
 0xaa2   :  { %v965_v46 = vpop.permute.xlu0 %964 }
 0xaa3   :  { %v1066_v47 = vpop.permute.xlu1 %1065  ;;  %v967_v48 = vmul.f32 %v3156_v28, %v965_v46 }
 0xaa4   :  { %v1068_v49 = vmul.f32 %v3158_v30, %v1066_v47 }
 0xaa5   :  { %969 = vrot.lane.b32.xlu0 %v967_v48, %s3287_s4 }
 0xaa6   :  { %1142 = vrot.lane.b32.xlu1 %v1068_v49, %s3287_s4 }
 0xb17   :  { %v970_v51 = vpop.permute.xlu0 %969 }
 0xb18   :  { %v1143_v52 = vpop.permute.xlu1 %1142  ;;  %972 = vst.msk [vmem:[#allocation3 + $0x4] sm:$0x3] %vm425_vm3, %v970_v51  ;;  %2786 = vmatmul.mubr.msk.f32.vlgmr.msra.gmra.mrb[10].mxu1 %vm152_vm2, %v970_v51 }
 0xb19   :  { %2797 = vmatmul.mubr.msk.f32.vlgmr.msra.gmra.mrb[12].mxu0 %vm152_vm2, %v1143_v52  ;;  %3020 = vmatpush3.bf16.msra.mxu1 %v3369_v7 }
 0xb1a   :  { %3021 = vmatprep.subr.bf16.mxu1 %v3283_v4  ;;  %2807 = vmatprep.mubr.msk.f32.mxu1 %vm3284_vm1, %v3285_v10 }
 0xb1b   :  { %3026 = vmatpush3.bf16.msra.mxu0 %v3412_v35  ;;  %2818 = vmatprep.mubr.msk.f32.mxu0 %vm3284_vm1, %v3285_v10 }
 0xb1c   :  { %3027 = vmatprep.subr.bf16.mxu0 %v3283_v4 }
 0xb1d   :  { %3023 = vmatpush3.bf16.msra.mxu1 %v3383_v12 }
 0xb1e   :  { %3030 = vmatprep.subr.bf16.mxu1 %v3283_v4 }
 0xb1f   :  { %3029 = vmatpush3.bf16.msra.mxu0 %v3432_v42 }
 0xb20   :  { %2808 = vmatmul.mubr.msk.f32.vlgmr.msra.gmra.mrb[12].mxu1 %vm152_vm2, %v1143_v52  ;;  %3036 = vmatprep.subr.bf16.mxu0 %v3283_v4 }
 0xb21   :  { %3032 = vmatpush3.bf16.msra.mxu1 %v3423_v39  ;;  %2829 = vmatprep.mubr.msk.f32.mxu1 %vm3284_vm1, %v3285_v10 }
 0xb22   :  { %3033 = vmatprep.subr.bf16.mxu1 %v3283_v4 }
 0xb25   :  { %3035 = vmatpush3.bf16.msra.mxu1 %v3436_v43 }
 0xb26   :  { %3042 = vmatprep.subr.bf16.mxu1 %v3283_v4 }
 0xbeb   :  { %v1137_v53 = vpop.f32.mrb[10].mxu1 }
 0xbec   :  { %v1212_v54 = vpop.f32.mrb[12].mxu0  ;;  %v2787_v55 = vpop.f32.mrb[11].mxu1 }
 0xbed   :  { %v1213_v56 = vadd.f32 %v1212_v54, %v1137_v53  ;;  %v2798_v57 = vpop.f32.mrb[13].mxu0 }
 0xbef   :  { %v1216_v58 = vadd.f32 %v3469_v50, %v1213_v56 }
 0xbf1   :  { %3163 = vtanh.f32 %v1216_v58  ;;  %v2506_v1 = vmul.f32 -1.442695, %v1216_v58 }
 0xbf3   :  { %v1313_v60 = vpop.f32.mrb[12].mxu1 }
 0xbf4   :  { %v1317_v61 = vadd.f32 %v1313_v60, %v1246_v59  ;;  %v2809_v62 = vpop.f32.mrb[13].mxu1 }
 0xbf6   :  { %3165 = vtanh.f32 %v1317_v61  ;;  %v2508_v2 = vmul.f32 -1.442695, %v1317_v61 }
 0xbf7   :  { %3167 = vpow2.f32 %v2506_v1 }
 0xbf8   :  { %3169 = vpow2.f32 %v2508_v2 }
 0xbfb   :  { %v3164_v63 = vpop.eup %3163 }
 0xbfc   :  { %1226 = vrot.lane.b32.xlu0 %v3164_v63, %s3286_s13 }
 0xc00   :  { %v3166_v0 = vpop.eup %3165 }
 0xc01   :  { %1327 = vrot.lane.b32.xlu1 %v3166_v0, %s3286_s13  ;;  %v3168_v3 = vpop.eup %3167 }
 0xc02   :  { %v1220_v5 = vadd.f32 1.0, %v3168_v3  ;;  %v3170_v6 = vpop.eup %3169 }
 0xc03   :  { %v1321_v8 = vadd.f32 1.0, %v3170_v6 }
 0xc04   :  { %3171 = vrcp.f32 %v1220_v5 }
 0xc05   :  { %3173 = vrcp.f32 %v1321_v8 }
 0xc0e   :  { %v3172_v9 = vpop.eup %3171 }
 0xc0f   :  { %v3174_v14 = vpop.eup %3173  ;;  %v1224_v17 = vmul.f32 %v3172_v9, %v3555_v40 }
 0xc10   :  { %v1325_v20 = vmul.f32 %v3174_v14, %v3557_v41 }
 0xc6e   :  { %v1227_v11 = vpop.permute.xlu0 %1226 }
 0xc6f   :  { %v1229_v13 = vmul.f32 %v3172_v9, %v1227_v11 }
 0xc71   :  { %1231 = vrot.lane.b32.xlu0 %v1229_v13, %s3286_s13 }
 0xc73   :  { %v1328_v15 = vpop.permute.xlu1 %1327 }
 0xc74   :  { %v1330_v16 = vmul.f32 %v3174_v14, %v1328_v15 }
 0xc76   :  { %1332 = vrot.lane.b32.xlu1 %v1330_v16, %s3286_s13 }
 0xce3   :  { %v1232_v18 = vpop.permute.xlu0 %1231 }
 0xce4   :  { %v3593_v19 = vadd.f32 %v1232_v18, %v1224_v17 }
 0xce6   :  { %3175 = vtanh.f32 %v3593_v19 }
 0xce8   :  { %v1333_v21 = vpop.permute.xlu1 %1332 }
 0xce9   :  { %v3597_v22 = vadd.f32 %v1333_v21, %v1325_v20  ;;  %v1792_v20 = vld [vmem:[#allocation2 + $0xc] sm:$0x3] }
 0xceb   :  { %3177 = vtanh.f32 %v3597_v22 }
 0xcf0   :  { %v3176_v23 = vpop.eup %3175 }
 0xcf1   :  { %1237 = vrot.lane.b32.xlu0 %v3176_v23, %s3286_s13 }
 0xcf5   :  { %v3178_v24 = vpop.eup %3177 }
 0xcf6   :  { %1338 = vrot.lane.b32.xlu1 %v3178_v24, %s3286_s13 }
 0xd63   :  { %v1238_v25 = vpop.permute.xlu0 %1237 }
 0xd64   :  { %v1240_v26 = vmul.f32 %v3172_v9, %v1238_v25 }
 0xd66   :  { %1242 = vrot.lane.b32.xlu0 %v1240_v26, %s3287_s4 }
 0xd68   :  { %v1339_v27 = vpop.permute.xlu1 %1338 }
 0xd69   :  { %v1341_v28 = vmul.f32 %v3174_v14, %v1339_v27 }
 0xd6b   :  { %1415 = vrot.lane.b32.xlu1 %v1341_v28, %s3287_s4 }
 0xdd8   :  { %v1243_v29 = vpop.permute.xlu0 %1242 }
 0xdd9   :  { %1245 = vst.msk [vmem:[#allocation3 + $0x6] sm:$0x3] %vm425_vm3, %v1243_v29  ;;  %2819 = vmatmul.mubr.msk.f32.vlgmr.msra.gmra.mrb[14].mxu0 %vm152_vm2, %v1243_v29 }
 0xdda   :  { %3038 = vmatpush3.bf16.msra.mxu0 %v3369_v7  ;;  %2840 = vmatprep.mubr.msk.f32.mxu0 %vm3284_vm1, %v3285_v10 }
 0xddb   :  { %3039 = vmatprep.subr.bf16.mxu0 %v3283_v4 }
 0xddd   :  { %v1416_v30 = vpop.permute.xlu1 %1415 }
 0xdde   :  { %3041 = vmatpush3.bf16.msra.mxu0 %v3383_v12  ;;  %2830 = vmatmul.mubr.msk.f32.vlgmr.msra.gmra.mrb[14].mxu1 %vm152_vm2, %v1416_v30 }
 0xddf   :  { %3044 = vmatpush3.bf16.msra.mxu1 %v3412_v35  ;;  %3048 = vmatprep.subr.bf16.mxu0 %v3283_v4 }
 0xde0   :  { %3045 = vmatprep.subr.bf16.mxu1 %v3283_v4  ;;  %2851 = vmatprep.mubr.msk.f32.mxu1 %vm3284_vm1, %v3285_v10 }
 0xde1   :  { %2841 = vmatmul.mubr.msk.f32.vlgmr.msra.gmra.mrb[16].mxu0 %vm152_vm2, %v1416_v30 }
 0xde2   :  { %3050 = vmatpush3.bf16.msra.mxu0 %v3423_v39  ;;  %2862 = vmatprep.mubr.msk.f32.mxu0 %vm3284_vm1, %v3285_v10 }
 0xde3   :  { %3047 = vmatpush3.bf16.msra.mxu1 %v3432_v42  ;;  %3051 = vmatprep.subr.bf16.mxu0 %v3283_v4 }
 0xde4   :  { %3054 = vmatprep.subr.bf16.mxu1 %v3283_v4 }
 0xde6   :  { %3053 = vmatpush3.bf16.msra.mxu0 %v3436_v43 }
 0xde7   :  { %3060 = vmatprep.subr.bf16.mxu0 %v3283_v4 }
 0xeac   :  { %v1410_v31 = vpop.f32.mrb[14].mxu0 }
 0xead   :  { %v2820_v32 = vpop.f32.mrb[15].mxu0 }
 0xeb1   :  { %v1485_v33 = vpop.f32.mrb[14].mxu1 }
 0xeb2   :  { %v1486_v34 = vadd.f32 %v1485_v33, %v1410_v31  ;;  %v2831_v36 = vpop.f32.mrb[15].mxu1 }
 0xeb4   :  { %v1489_v37 = vadd.f32 %v3469_v50, %v1486_v34  ;;  %v1586_v40 = vpop.f32.mrb[16].mxu0 }
 0xeb5   :  { %v1590_v41 = vadd.f32 %v1586_v40, %v1519_v38  ;;  %v2842_v44 = vpop.f32.mrb[17].mxu0 }
 0xeb6   :  { %3179 = vtanh.f32 %v1489_v37  ;;  %v2511_v47 = vmul.f32 -1.442695, %v1489_v37 }
 0xeb7   :  { %3181 = vtanh.f32 %v1590_v41  ;;  %v2513_v48 = vmul.f32 -1.442695, %v1590_v41 }
 0xeb8   :  { %3183 = vpow2.f32 %v2511_v47 }
 0xeb9   :  { %3185 = vpow2.f32 %v2513_v48 }
 0xec0   :  { %v3180_v45 = vpop.eup %3179 }
 0xec1   :  { %v3182_v46 = vpop.eup %3181  ;;  %1499 = vrot.lane.b32.xlu0 %v3180_v45, %s3286_s13 }
 0xec2   :  { %1600 = vrot.lane.b32.xlu1 %v3182_v46, %s3286_s13  ;;  %v3184_v49 = vpop.eup %3183 }
 0xec3   :  { %v3186_v51 = vpop.eup %3185  ;;  %v1493_v52 = vadd.f32 1.0, %v3184_v49 }
 0xec4   :  { %v1594_v53 = vadd.f32 1.0, %v3186_v51 }
 0xec5   :  { %3187 = vrcp.f32 %v1493_v52 }
 0xec6   :  { %3189 = vrcp.f32 %v1594_v53 }
 0xecf   :  { %v3188_v54 = vpop.eup %3187 }
 0xed0   :  { %v3190_v56 = vpop.eup %3189  ;;  %v1497_v60 = vmul.f32 %v3188_v54, %v3593_v19 }
 0xed1   :  { %v1598_v61 = vmul.f32 %v3190_v56, %v3597_v22 }
 0xf33   :  { %v1500_v55 = vpop.permute.xlu0 %1499 }
 0xf34   :  { %v1601_v57 = vpop.permute.xlu1 %1600  ;;  %v1502_v58 = vmul.f32 %v3188_v54, %v1500_v55 }
 0xf35   :  { %v1603_v59 = vmul.f32 %v3190_v56, %v1601_v57 }
 0xf36   :  { %1504 = vrot.lane.b32.xlu0 %v1502_v58, %s3286_s13 }
 0xf37   :  { %1605 = vrot.lane.b32.xlu1 %v1603_v59, %s3286_s13 }
 0xfa8   :  { %v1505_v62 = vpop.permute.xlu0 %1504 }
 0xfa9   :  { %v1606_v63 = vpop.permute.xlu1 %1605  ;;  %v3633_v0 = vadd.f32 %v1505_v62, %v1497_v60  ;;  %v2065_v60 = vld [vmem:[#allocation2 + $0xe] sm:$0x3] }
 0xfaa   :  { %v3635_v1 = vadd.f32 %v1606_v63, %v1598_v61 }
 0xfab   :  { %3191 = vtanh.f32 %v3633_v0 }
 0xfac   :  { %3193 = vtanh.f32 %v3635_v1 }
 0xfb5   :  { %v3192_v2 = vpop.eup %3191 }
 0xfb6   :  { %v3194_v3 = vpop.eup %3193  ;;  %1510 = vrot.lane.b32.xlu0 %v3192_v2, %s3286_s13 }
 0xfb7   :  { %1611 = vrot.lane.b32.xlu1 %v3194_v3, %s3286_s13 }
0x1028   :  { %v1511_v5 = vpop.permute.xlu0 %1510 }
0x1029   :  { %v1612_v6 = vpop.permute.xlu1 %1611  ;;  %v1513_v8 = vmul.f32 %v3188_v54, %v1511_v5 }
0x102a   :  { %v1614_v9 = vmul.f32 %v3190_v56, %v1612_v6 }
0x102b   :  { %1515 = vrot.lane.b32.xlu0 %v1513_v8, %s3287_s4 }
0x102c   :  { %1688 = vrot.lane.b32.xlu1 %v1614_v9, %s3287_s4 }
0x109d   :  { %v1516_v11 = vpop.permute.xlu0 %1515 }
0x109e   :  { %v1689_v13 = vpop.permute.xlu1 %1688  ;;  %1518 = vst.msk [vmem:[#allocation3 + $0x8] sm:$0x3] %vm425_vm3, %v1516_v11  ;;  %2852 = vmatmul.mubr.msk.f32.vlgmr.msra.gmra.mrb[16].mxu1 %vm152_vm2, %v1516_v11 }
0x109f   :  { %2863 = vmatmul.mubr.msk.f32.vlgmr.msra.gmra.mrb[18].mxu0 %vm152_vm2, %v1689_v13  ;;  %3056 = vmatpush3.bf16.msra.mxu1 %v3369_v7 }
0x10a0   :  { %3057 = vmatprep.subr.bf16.mxu1 %v3283_v4  ;;  %2873 = vmatprep.mubr.msk.f32.mxu1 %vm3284_vm1, %v3285_v10 }
0x10a1   :  { %3062 = vmatpush3.bf16.msra.mxu0 %v3412_v35  ;;  %2884 = vmatprep.mubr.msk.f32.mxu0 %vm3284_vm1, %v3285_v10 }
0x10a2   :  { %3063 = vmatprep.subr.bf16.mxu0 %v3283_v4 }
0x10a3   :  { %3059 = vmatpush3.bf16.msra.mxu1 %v3383_v12 }
0x10a4   :  { %3066 = vmatprep.subr.bf16.mxu1 %v3283_v4 }
0x10a5   :  { %3065 = vmatpush3.bf16.msra.mxu0 %v3432_v42 }
0x10a6   :  { %2874 = vmatmul.mubr.msk.f32.vlgmr.msra.gmra.mrb[18].mxu1 %vm152_vm2, %v1689_v13  ;;  %3072 = vmatprep.subr.bf16.mxu0 %v3283_v4 }
0x10a7   :  { %3068 = vmatpush3.bf16.msra.mxu1 %v3423_v39  ;;  %2895 = vmatprep.mubr.msk.f32.mxu1 %vm3284_vm1, %v3285_v10 }
0x10a8   :  { %3069 = vmatprep.subr.bf16.mxu1 %v3283_v4 }
0x10ab   :  { %3071 = vmatpush3.bf16.msra.mxu1 %v3436_v43 }
0x10ac   :  { %3078 = vmatprep.subr.bf16.mxu1 %v3283_v4 }
0x1171   :  { %v1683_v14 = vpop.f32.mrb[16].mxu1 }
0x1172   :  { %v1758_v15 = vpop.f32.mrb[18].mxu0  ;;  %v2853_v16 = vpop.f32.mrb[17].mxu1 }
0x1173   :  { %v1759_v17 = vadd.f32 %v1758_v15, %v1683_v14  ;;  %v2864_v18 = vpop.f32.mrb[19].mxu0 }
0x1175   :  { %v1762_v19 = vadd.f32 %v3469_v50, %v1759_v17 }
0x1177   :  { %3195 = vtanh.f32 %v1762_v19  ;;  %v2516_v26 = vmul.f32 -1.442695, %v1762_v19 }
0x1179   :  { %v1859_v21 = vpop.f32.mrb[18].mxu1 }
0x117a   :  { %v1863_v22 = vadd.f32 %v1859_v21, %v1792_v20  ;;  %v2875_v23 = vpop.f32.mrb[19].mxu1 }
0x117c   :  { %3197 = vtanh.f32 %v1863_v22  ;;  %v2518_v27 = vmul.f32 -1.442695, %v1863_v22 }
0x117d   :  { %3199 = vpow2.f32 %v2516_v26 }
0x117e   :  { %3201 = vpow2.f32 %v2518_v27  ;;  %v2353_v27 = vld [vmem:[#allocation3] sm:$0xff] }
0x1181   :  { %v3196_v24 = vpop.eup %3195 }
0x1182   :  { %1772 = vrot.lane.b32.xlu0 %v3196_v24, %s3286_s13 }
0x1186   :  { %v3198_v25 = vpop.eup %3197 }
0x1187   :  { %1873 = vrot.lane.b32.xlu1 %v3198_v25, %s3286_s13  ;;  %v3200_v28 = vpop.eup %3199 }
0x1188   :  { %v1766_v29 = vadd.f32 1.0, %v3200_v28  ;;  %v3202_v30 = vpop.eup %3201 }
0x1189   :  { %v1867_v31 = vadd.f32 1.0, %v3202_v30 }
0x118a   :  { %3203 = vrcp.f32 %v1766_v29 }
0x118b   :  { %3205 = vrcp.f32 %v1867_v31 }
0x1194   :  { %v3204_v32 = vpop.eup %3203 }
0x1195   :  { %v3206_v36 = vpop.eup %3205  ;;  %v1770_v40 = vmul.f32 %v3204_v32, %v3633_v0 }
0x1196   :  { %v1871_v45 = vmul.f32 %v3206_v36, %v3635_v1 }
0x11f4   :  { %v1773_v33 = vpop.permute.xlu0 %1772 }
0x11f5   :  { %v1775_v34 = vmul.f32 %v3204_v32, %v1773_v33 }
0x11f7   :  { %1777 = vrot.lane.b32.xlu0 %v1775_v34, %s3286_s13 }
0x11f9   :  { %v1874_v37 = vpop.permute.xlu1 %1873 }
0x11fa   :  { %v1876_v38 = vmul.f32 %v3206_v36, %v1874_v37 }
0x11fc   :  { %1878 = vrot.lane.b32.xlu1 %v1876_v38, %s3286_s13 }
0x1269   :  { %v1778_v41 = vpop.permute.xlu0 %1777 }
0x126a   :  { %v3671_v44 = vadd.f32 %v1778_v41, %v1770_v40 }
0x126c   :  { %3207 = vtanh.f32 %v3671_v44 }
0x126e   :  { %v1879_v46 = vpop.permute.xlu1 %1878 }
0x126f   :  { %v3675_v47 = vadd.f32 %v1879_v46, %v1871_v45 }
0x1271   :  { %3209 = vtanh.f32 %v3675_v47 }
0x1276   :  { %v3208_v48 = vpop.eup %3207 }
0x1277   :  { %1783 = vrot.lane.b32.xlu0 %v3208_v48, %s3286_s13 }
0x127b   :  { %v3210_v49 = vpop.eup %3209 }
0x127c   :  { %1884 = vrot.lane.b32.xlu1 %v3210_v49, %s3286_s13  ;;  %v2356_v49 = vld [vmem:[%s3784_s7 + $0x8] sm:$0xff] }
0x12e9   :  { %v1784_v51 = vpop.permute.xlu0 %1783 }
0x12ea   :  { %v1786_v52 = vmul.f32 %v3204_v32, %v1784_v51 }
0x12ec   :  { %1788 = vrot.lane.b32.xlu0 %v1786_v52, %s3287_s4  ;;  %v2357_v52 = vld [vmem:[%s3784_s7 + $0x10] sm:$0xff] }
0x12ee   :  { %v1885_v53 = vpop.permute.xlu1 %1884 }
0x12ef   :  { %v1887_v54 = vmul.f32 %v3206_v36, %v1885_v53  ;;  %v2358_v53 = vld [vmem:[%s3784_s7 + $0x18] sm:$0xff] }
0x12f1   :  { %1961 = vrot.lane.b32.xlu1 %v1887_v54, %s3287_s4  ;;  %v3094_v54 = vpack.c.bf16 %v2358_v53, %v2357_v52 }
0x135e   :  { %v1789_v55 = vpop.permute.xlu0 %1788 }
0x135f   :  { %1791 = vst.msk [vmem:[#allocation3 + $0xa] sm:$0x3] %vm425_vm3, %v1789_v55  ;;  %2885 = vmatmul.mubr.msk.f32.vlgmr.msra.gmra.mrb[20].mxu0 %vm152_vm2, %v1789_v55 }
0x1360   :  { %3074 = vmatpush3.bf16.msra.mxu0 %v3369_v7  ;;  %2906 = vmatprep.mubr.msk.f32.mxu0 %vm3284_vm1, %v3285_v10 }
0x1361   :  { %3075 = vmatprep.subr.bf16.mxu0 %v3283_v4 }
0x1363   :  { %v1962_v56 = vpop.permute.xlu1 %1961 }
0x1364   :  { %3077 = vmatpush3.bf16.msra.mxu0 %v3383_v12  ;;  %2896 = vmatmul.mubr.msk.f32.vlgmr.msra.gmra.mrb[20].mxu1 %vm152_vm2, %v1962_v56 }
0x1365   :  { %3084 = vmatprep.subr.bf16.mxu0 %v3283_v4  ;;  %3080 = vmatpush3.bf16.msra.mxu1 %v3412_v35 }
0x1366   :  { %3081 = vmatprep.subr.bf16.mxu1 %v3283_v4  ;;  %2917 = vmatprep.mubr.msk.f32.mxu1 %vm3284_vm1, %v3285_v10 }
0x1367   :  { %2907 = vmatmul.mubr.msk.f32.vlgmr.msra.gmra.mrb[22].mxu0 %vm152_vm2, %v1962_v56 }
0x1368   :  { %3086 = vmatpush3.bf16.msra.mxu0 %v3423_v39  ;;  %2928 = vmatprep.mubr.msk.f32.mxu0 %vm3284_vm1, %v3285_v10 }
0x1369   :  { %3087 = vmatprep.subr.bf16.mxu0 %v3283_v4  ;;  %3083 = vmatpush3.bf16.msra.mxu1 %v3432_v42 }
0x136c   :  { %3089 = vmatpush3.bf16.msra.mxu0 %v3436_v43 }
0x1432   :  { %v1956_v7 = vpop.f32.mrb[20].mxu0 }
0x1433   :  { %v2886_v12 = vpop.f32.mrb[21].mxu0 }
0x1437   :  { %v2031_v35 = vpop.f32.mrb[20].mxu1 }
0x1438   :  { %v2032_v57 = vadd.f32 %v2031_v35, %v1956_v7  ;;  %v2897_v58 = vpop.f32.mrb[21].mxu1 }
0x143a   :  { %v2035_v59 = vadd.f32 %v3469_v50, %v2032_v57  ;;  %v2132_v61 = vpop.f32.mrb[22].mxu0 }
0x143b   :  { %v2136_v62 = vadd.f32 %v2132_v61, %v2065_v60  ;;  %v2908_v39 = vpop.f32.mrb[23].mxu0 }
0x143c   :  { %3211 = vtanh.f32 %v2035_v59  ;;  %v2521_v4 = vmul.f32 -1.442695, %v2035_v59 }
0x143d   :  { %3213 = vtanh.f32 %v2136_v62  ;;  %v2523_v42 = vmul.f32 -1.442695, %v2136_v62 }
0x143e   :  { %3215 = vpow2.f32 %v2521_v4 }
0x143f   :  { %3217 = vpow2.f32 %v2523_v42 }
0x1446   :  { %v3212_v10 = vpop.eup %3211 }
0x1447   :  { %v3214_v63 = vpop.eup %3213  ;;  %2045 = vrot.lane.b32.xlu0 %v3212_v10, %s3286_s13 }
0x1448   :  { %2146 = vrot.lane.b32.xlu1 %v3214_v63, %s3286_s13  ;;  %v3216_v43 = vpop.eup %3215 }
0x1449   :  { %v3218_v0 = vpop.eup %3217  ;;  %v2039_v1 = vadd.f32 1.0, %v3216_v43 }
0x144a   :  { %v2140_v2 = vadd.f32 1.0, %v3218_v0 }
0x144b   :  { %3219 = vrcp.f32 %v2039_v1 }
0x144c   :  { %3221 = vrcp.f32 %v2140_v2 }
0x1455   :  { %v3220_v3 = vpop.eup %3219 }
0x1456   :  { %v3222_v6 = vpop.eup %3221  ;;  %v2043_v13 = vmul.f32 %v3220_v3, %v3671_v44 }
0x1457   :  { %v2144_v14 = vmul.f32 %v3222_v6, %v3675_v47 }
0x14b9   :  { %v2046_v5 = vpop.permute.xlu0 %2045 }
0x14ba   :  { %v2147_v8 = vpop.permute.xlu1 %2146  ;;  %v2048_v9 = vmul.f32 %v3220_v3, %v2046_v5 }
0x14bb   :  { %v2149_v11 = vmul.f32 %v3222_v6, %v2147_v8 }
0x14bc   :  { %2050 = vrot.lane.b32.xlu0 %v2048_v9, %s3286_s13 }
0x14bd   :  { %2151 = vrot.lane.b32.xlu1 %v2149_v11, %s3286_s13 }
0x152e   :  { %v2051_v15 = vpop.permute.xlu0 %2050 }
0x152f   :  { %v2152_v16 = vpop.permute.xlu1 %2151  ;;  %v2053_v17 = vadd.f32 %v2051_v15, %v2043_v13 }
0x1530   :  { %v2154_v18 = vadd.f32 %v2152_v16, %v2144_v14 }
0x1531   :  { %3223 = vtanh.f32 %v2053_v17 }
0x1532   :  { %3225 = vtanh.f32 %v2154_v18 }
0x153b   :  { %v3224_v19 = vpop.eup %3223 }
0x153c   :  { %v3226_v20 = vpop.eup %3225  ;;  %2056 = vrot.lane.b32.xlu0 %v3224_v19, %s3286_s13 }
0x153d   :  { %2157 = vrot.lane.b32.xlu1 %v3226_v20, %s3286_s13 }
0x15ae   :  { %v2057_v21 = vpop.permute.xlu0 %2056 }
0x15af   :  { %v2158_v22 = vpop.permute.xlu1 %2157  ;;  %v2059_v23 = vmul.f32 %v3220_v3, %v2057_v21 }
0x15b0   :  { %v2160_v24 = vmul.f32 %v3222_v6, %v2158_v22 }
0x15b1   :  { %2061 = vrot.lane.b32.xlu0 %v2059_v23, %s3287_s4 }
0x15b2   :  { %2234 = vrot.lane.b32.xlu1 %v2160_v24, %s3287_s4 }
0x1623   :  { %v2062_v25 = vpop.permute.xlu0 %2061 }
0x1624   :  { %v2235_v26 = vpop.permute.xlu1 %2234  ;;  %2064 = vst.msk [vmem:[#allocation3 + $0xc] sm:$0x3] %vm425_vm3, %v2062_v25  ;;  %2918 = vmatmul.mubr.msk.f32.vlgmr.msra.gmra.mrb[22].mxu1 %vm152_vm2, %v2062_v25 }
0x1625   :  { %2339 = vst.msk [vmem:[#allocation4] sm:$0x3] %vm425_vm3, %v2235_v26  ;;  %2929 = vmatmul.mubr.msk.f32.vlgmr.msra.gmra.mrb[24].mxu0 %vm152_vm2, %v2235_v26  ;;  %2939 = vmatprep.mubr.msk.f32.mxu1 %vm152_vm2, %v2353_v27 }
0x16f7   :  { %v2229_v28 = vpop.f32.mrb[22].mxu1 }
0x16f8   :  { %v2304_v29 = vpop.f32.mrb[24].mxu0  ;;  %v2919_v30 = vpop.f32.mrb[23].mxu1 }
0x16f9   :  { %v2305_v31 = vadd.f32 %v2304_v29, %v2229_v28  ;;  %v2930_v32 = vpop.f32.mrb[25].mxu0 }
0x16fb   :  { %v2308_v33 = vadd.f32 %v3469_v50, %v2305_v31  ;;  %v2355_v50 = vld [vmem:[%s3784_s7] sm:$0xff]  ;;  %s3289_s7 = smov [#allocation4]  }
0x16fc   :  { %v3090_v51 = vpack.c.bf16 %v2356_v49, %v2355_v50  ;;  %s2456_s16 = sshll.u32 %s3289_s7, 4  ;;  %s2457_s16 = int_to_ptr.vmem [resolvable:$true] %s2456_s16 }
0x16fd   :  { %3227 = vtanh.f32 %v2308_v33  ;;  %v2526_v36 = vmul.f32 -1.442695, %v2308_v33  ;;  %s3235_s19 = scalar_lea.vmem %s2457_s16, 64  ;;  %p3240_p1 = scmp.lt.s32.totalorder %s2457_s16, %s2457_s16 }
0x16fe   :  { %3091 = vmatprep.subr.bf16.mxu1 %v3090_v51  ;;  %p3236_p0 = scmp.ne.s32.totalorder %s2457_s16, %s3235_s19  ;;  %p3241_p2 = scmp.lt.s32.totalorder %s3235_s19, %s3235_s19 }
0x16ff   :  { %3229 = vpow2.f32 %v2526_v36  ;;  %3093 = vmatpush3.bf16.msra.mxu1 %v3090_v51 }
0x1700   :  { %3095 = vmatprep.subr.bf16.mxu1 %v3094_v54  ;;  %p3242_p3 = por %p3241_p2, %p3240_p1 }
0x1702   :  { %p3243_p4 = pnand %p3242_p3, %p3236_p0 }
0x1703   :  { %3097 = vmatpush3.bf16.msra.mxu1 %v3094_v54 }
0x1707   :  { %v3228_v34 = vpop.eup %3227 }
0x1708   :  { %2318 = vrot.lane.b32.xlu0 %v3228_v34, %s3286_s13 }
0x1709   :  { %v3230_v37 = vpop.eup %3229 }
0x170a   :  { %v2312_v38 = vadd.f32 1.0, %v3230_v37 }
0x170c   :  { %3231 = vrcp.f32 %v2312_v38 }
0x1716   :  { %v3232_v40 = vpop.eup %3231 }
0x1717   :  { %v2316_v45 = vmul.f32 %v3232_v40, %v2053_v17 }
0x177a   :  { %v2319_v41 = vpop.permute.xlu0 %2318 }
0x177b   :  { %v2321_v44 = vmul.f32 %v3232_v40, %v2319_v41 }
0x177d   :  { %2323 = vrot.lane.b32.xlu1 %v2321_v44, %s3286_s13 }
0x17ef   :  { %v2324_v46 = vpop.permute.xlu1 %2323 }
0x17f0   :  { %v2326_v47 = vadd.f32 %v2324_v46, %v2316_v45 }
0x17f2   :  { %3233 = vtanh.f32 %v2326_v47 }
0x17fc   :  { %v3234_v48 = vpop.eup %3233 }
0x17fd   :  { %2329 = vrot.lane.b32.xlu0 %v3234_v48, %s3286_s13 }
0x1801   :  { %2343 = vrot.lane.b32.xlu0 %v2154_v18, %s3288_s6 }
0x186f   :  { %v2330_v55 = vpop.permute.xlu0 %2329 }
0x1870   :  { %v2332_v56 = vmul.f32 %v3232_v40, %v2330_v55 }
0x1872   :  { %2334 = vrot.lane.b32.xlu1 %v2332_v56, %s3287_s4 }
0x1873   :  { %v2344_v7 = vpop.permute.xlu0 %2343 }
0x1874   :  { %2346 = vst.msk [vmem:[#allocation6] sm:$0x3] %vm425_vm3, %v2344_v7 }
0x1876   :  { %2348 = vrot.lane.b32.xlu1 %v2326_v47, %s3288_s6 }
0x18e4   :  { %v2335_v12 = vpop.permute.xlu1 %2334 }
0x18e5   :  { %2337 = vst.msk [vmem:[#allocation3 + $0xe] sm:$0x3] %vm425_vm3, %v2335_v12  ;;  %2341 = vst.msk [vmem:[#allocation4 + $0x2] sm:$0x3] %vm425_vm3, %v2335_v12 }
0x18e8   :  { %v2349_v35 = vpop.permute.xlu1 %2348 }
0x18e9   :  { %2352 = vst.msk [vmem:[#allocation6 + $0x2] sm:$0x3] %vm425_vm3, %v2349_v35 }
0x18ec   :  { %v2354_v57 = vld [vmem:[#allocation3 + $0x8] sm:$0xff] }
0x18ed   :  { %2940 = vmatmul.mubr.msk.f32.vlgmr.msra.gmra.mrb[24].mxu1 %vm152_vm2, %v2354_v57 }
0x18ee   :  { %3246 = shalt.err (!%p3243_p4)
}
0x18ef   :  { %s3247_s22 = scalar_lea.hbm %s3787_s10, 64 }
0x18f0   :  { %p3248_p5 = scmp.ne.s32.totalorder %s3787_s10, %s3247_s22  ;;  %p3251_p6 = scmp.lt.u32.totalorder %s3247_s22, %s3787_s10 }
0x18f2   :  { %p3253_p7 = pnand %p3251_p6, %p3248_p5 }
0x18f4   :  { %3256 = shalt.err (!%p3253_p7)
}
0x18f5   :  { %s3291_s1 = smov 2   ;;  %s3257_s5 = scalar_lea.vmem %s2469_s18, 64 }
0x18f6   :  { %2462 = dma.vmem_to_hbm [thread:$0]  %s2457_s16, 64, %s3787_s10, [#allocation5], %s3286_s13, %s3286_s13, %s3291_s1  }
0x18f7   :  { %p3258_p8 = scmp.ne.s32.totalorder %s2469_s18, %s3257_s5  ;;  %p3262_p9 = scmp.lt.s32.totalorder %s2469_s18, %s2469_s18 }
0x18f8   :  { %p3263_p10 = scmp.lt.s32.totalorder %s3257_s5, %s3257_s5 }
0x18fa   :  { %p3264_p11 = por %p3263_p10, %p3262_p9 }
0x18fc   :  { %p3265_p12 = pnand %p3264_p11, %p3258_p8 }
0x18fe   :  { %3268 = shalt.err (!%p3265_p12)
}
0x18ff   :  { %s3269_s29 = scalar_lea.hbm %s3788_s11, 64 }
0x1900   :  { %p3270_p13 = scmp.ne.s32.totalorder %s3788_s11, %s3269_s29  ;;  %p3273_p0 = scmp.lt.u32.totalorder %s3269_s29, %s3788_s11 }
0x1902   :  { %p3275_p1 = pnand %p3273_p0, %p3270_p13 }
0x1904   :  { %3278 = shalt.err (!%p3275_p1)
}
0x1905   :  { %2474 = dma.vmem_to_hbm [thread:$0]  %s2469_s18, 64, %s3788_s11, [#allocation7], %s3286_s13, %s3286_s13, %s3291_s1  }
0x1906   :  { %v2527_v58 = vld [vmem:[%s3785_s8] ss:$0 sm:$0xff] }
0x19c0   :  { %v2941_v59 = vpop.f32.mrb[24].mxu1 }
0x19c1   :  { %v2444_v60 = vadd.f32 %v2941_v59, %v2527_v58  ;;  %v2438_v61 = vpop.f32.mrb[25].mxu1 }
0x19c2   :  { %v2439_v62 = vadd.f32 %v2527_v58, %v2438_v61 }
0x19c3   :  { %2448 = vst [vmem:[%s3786_s9 + $0x8] sm:$0xff] %v2444_v60 }
0x19c4   :  { %2447 = vst [vmem:[%s3786_s9] sm:$0xff] %v2439_v62 }
0x19c5   :  { %3279 = dma.done.wait [#allocation5], 64  }
0x19c6   :  { %3280 = vsyncadd [#allocation5], 4294967232 }
0x19c7   :  { %3281 = dma.done.wait [#allocation7], 64  }
0x19c8   :  { %3282 = vsyncadd [#allocation7], 4294967232 }
0x19c9   :  { %2483 = vsyncpa [#allocation5], 1 }
0x19ca   :  { %2484 = vsyncpa [#allocation7], 1 }

</bundles_post_ra>
